<compile_context>
chip_gen: v5e
topology: v5e:2x2
jax: 0.10.0
libtpu: 0.0.40
codegen_flags: <defaults>
</compile_context>

<pallas_src>
import functools
from dataclasses import dataclass

import numpy as np
import jax
import jax.numpy as jnp
from jax import lax
from jax.experimental import pallas as pl
from jax.experimental.pallas import tpu as pltpu


# ----------------------------------------------------------------------------
# Host-side table construction (numpy only, no (A, HW, R) one-hot intermediate)
# ----------------------------------------------------------------------------
def _round_half_away(v):
    # std::round semantics (round half away from zero), unlike np.round.
    return np.sign(v) * np.floor(np.abs(v) + 0.5)


def _pad_to(x, m):
    return ((x + m - 1) // m) * m


def build_rho_index_table(H, W, numangle, numrho):
    """r_idx[a, p] = rho bin of pixel p (= y*W + x) at angle a, or -1 if the
    bin falls outside [0, numrho) (those contributions are dropped, matching
    the bounds guard of the CUDA kernel / the previous one-hot formulation).

    Matches initTab() + line_accum_forward_kernel() of the CUDA extension:
      irho    = int(sqrt(H^2 + W^2) + 1) / (numrho - 1)
      theta_a = a * pi / numangle
      xx = x - W//2, yy = y - H//2
      r  = round(xx*cos(theta_a)/irho + yy*sin(theta_a)/irho) + numrho//2
    """
    D = int(np.sqrt(H * H + W * W) + 1)
    irho = D / float(numrho - 1)
    itheta = np.pi / numangle
    angles = np.arange(numangle, dtype=np.float64) * itheta
    tab_cos = np.cos(angles) / irho                       # (A,)
    tab_sin = np.sin(angles) / irho                       # (A,)
    xs = (np.arange(W) - W // 2).astype(np.float64)       # xx
    ys = (np.arange(H) - H // 2).astype(np.float64)       # yy
    proj = (xs[None, None, :] * tab_cos[:, None, None]
            + ys[None, :, None] * tab_sin[:, None, None])  # (A, H, W)
    r = _round_half_away(proj).astype(np.int64) + numrho // 2
    r = np.where((r >= 0) & (r < numrho), r, -1)           # drop out-of-range
    return r.reshape(numangle, H * W).astype(np.int32)     # (A, HW)


# ----------------------------------------------------------------------------
# Kernel
# ----------------------------------------------------------------------------
def _dht_kernel(feat_ref, ridx_ref, out_ref, acc_ref, *, n_ang, rho_pad,
                compute_dtype):
    """One (tm, tk) x (tk, n_ang*rho_pad) MXU step of the Hough matmul.

    feat_ref: (tm, tk)               activations (bf16 or f32)
    ridx_ref: (1, tk, n_ang) int32   rho bin per (pixel, angle); -1 = dropped
    out_ref : (tm, n_ang*rho_pad) f32
    acc_ref : (tm, n_ang*rho_pad) f32 VMEM accumulator (resident across k)
    """
    k = pl.program_id(2)

    @pl.when(k == 0)
    def _init():
        acc_ref[...] = jnp.zeros_like(acc_ref)

    feat = feat_ref[...]                                   # (tm, tk)
    r_idx = ridx_ref[0]                                    # (tk, n_ang) int32
    tk = r_idx.shape[0]
    rho_iota = lax.broadcasted_iota(jnp.int32, (tk, rho_pad), 1)

    # Regenerate the one-hot block in-kernel: onehot[p, a*rho_pad + rho] = 1
    # iff r_idx[p, a] == rho.  Pure VPU work (tk*tn compares) that overlaps
    # with the MXU's tm*tk*tn MACs; 128-aligned lane concatenation keeps the
    # operand lane-dense.  -1 (dropped) and padded rho bins never match.
    onehot = jnp.concatenate(
        [(rho_iota == r_idx[:, a:a + 1]).astype(compute_dtype)
         for a in range(n_ang)],
        axis=-1)                                           # (tk, n_ang*rho_pad)

    acc_ref[...] += jnp.dot(feat, onehot,
                            preferred_element_type=jnp.float32)

    @pl.when(k == pl.num_programs(2) - 1)
    def _finalize():
        out_ref[...] = acc_ref[...].astype(out_ref.dtype)


# ----------------------------------------------------------------------------
# Planning (per-generation tile / VMEM gating) + wrapper
# ----------------------------------------------------------------------------
def _vmem_capacity_bytes():
    try:
        cap = getattr(pltpu.get_tpu_info(), "vmem_capacity_bytes", None)
        if cap:
            return int(cap)
    except Exception:
        pass
    return 64 << 20        # conservative default: v7x has 64 MiB per TensorCore


@dataclass
class _DHTPlan:
    numangle: int
    numrho: int
    rho_pad: int
    n_ang: int
    a_pad: int
    tm: int
    tk: int
    hw_pad: int
    vmem_limit: int
    table: jax.Array       # (a_pad // n_ang, hw_pad, n_ang) int32, on device


def make_plan(NC, H, W, numangle, numrho, compute_dtype=jnp.bfloat16):
    HW = H * W
    vmem_cap = _vmem_capacity_bytes()
    big_vmem = vmem_cap >= (100 << 20)            # v5e / v6e: 128 MiB VMEM

    rho_pad = _pad_to(numrho, 128)                # lane-dense output tiles
    # Group enough angles per output tile to feed the 256-wide MXU N dim on
    # v6e/v7x without blowing up the f32 accumulator (gate by VMEM size).
    tn_target = 1024 if big_vmem else 512
    n_ang = max(1, min(numangle, tn_target // rho_pad))
    a_pad = _pad_to(numangle, n_ang)

    tk = min(512, _pad_to(HW, 128))               # contraction tile (pixels)
    hw_pad = _pad_to(HW, tk)

    # Large row tile => feat is re-streamed fewer times across the angle-group
    # axis and the MXU M dim is well filled; gated by generation VMEM.
    tm = min(512 if big_vmem else 256, _pad_to(NC, 8))

    tn = n_ang * rho_pad
    cbytes = jnp.dtype(compute_dtype).itemsize
    working = (2 * tm * tk * cbytes               # double-buffered feat tile
               + 2 * tk * 128 * 4                 # double-buffered rho-index tile
               + 2 * tm * tn * 4                  # double-buffered output tile
               + tm * tn * 4                      # f32 accumulator scratch
               + 2 * tk * tn * cbytes)            # in-kernel one-hot temporaries
    vmem_limit = int(min(max(2 * working, 32 << 20), int(0.75 * vmem_cap)))

    # Rho-index table, laid out (angle_group, pixel, angle_in_group) so the
    # pixel axis lands on sublanes (ready for the lane-broadcast compare).
    r = build_rho_index_table(H, W, numangle, numrho)          # (A, HW)
    r_full = np.full((a_pad, hw_pad), -1, dtype=np.int32)
    r_full[:numangle, :HW] = r
    tbl = np.ascontiguousarray(
        r_full.reshape(a_pad // n_ang, n_ang, hw_pad).transpose(0, 2, 1))
    table = jnp.asarray(tbl, dtype=jnp.int32)

    return _DHTPlan(numangle=numangle, numrho=numrho, rho_pad=rho_pad,
                    n_ang=n_ang, a_pad=a_pad, tm=tm, tk=tk, hw_pad=hw_pad,
                    vmem_limit=vmem_limit, table=table)


def dht_forward(feat, numangle, numrho, *, compute_dtype=jnp.bfloat16,
                plan=None):
    """Deep Hough Transform forward.  feat: (N, C, H, W) float.

    compute_dtype=jnp.bfloat16 (default) runs the MXU at full bf16 rate; the
    one-hot operand is exactly 0/1 and accumulation is f32, so only feat's
    own bf16 quantisation error (~2^-9 relative) is introduced.  Pass
    jnp.float32 for near-exact f32 parity (slower MXU path).
    """
    N, C, H, W = feat.shape
    NC, HW = N * C, H * W
    if plan is None:
        plan = make_plan(NC, H, W, numangle, numrho, compute_dtype)

    tm, tk, n_ang, rho_pad = plan.tm, plan.tk, plan.n_ang, plan.rho_pad
    a_pad, hw_pad = plan.a_pad, plan.hw_pad
    tn = n_ang * rho_pad
    NC_pad = _pad_to(NC, tm)

    feat_flat = feat.reshape(NC, HW).astype(compute_dtype)
    feat_flat = jnp.pad(feat_flat, ((0, NC_pad - NC), (0, hw_pad - HW)))

    grid = (NC_pad // tm, a_pad // n_ang, hw_pad // tk)

    kernel = functools.partial(_dht_kernel, n_ang=n_ang, rho_pad=rho_pad,
                               compute_dtype=compute_dtype)

    out = pl.pallas_call(
        kernel,
        out_shape=jax.ShapeDtypeStruct((NC_pad, a_pad * rho_pad), jnp.float32),
        grid_spec=pltpu.PrefetchScalarGridSpec(
            num_scalar_prefetch=0,
            grid=grid,
            in_specs=[
                # feat tile: varies with (row tile i, contraction tile k).
                pl.BlockSpec((tm, tk), lambda i, j, k: (i, k)),
                # rho-index tile: tiny (tk x n_ang int32) stream that replaces
                # the huge one-hot Hough matrix of the previous version.
                pl.BlockSpec((1, tk, n_ang), lambda i, j, k: (j, k, 0)),
            ],
            out_specs=pl.BlockSpec((tm, tn), lambda i, j, k: (i, j)),
            scratch_shapes=[pltpu.VMEM((tm, tn), jnp.float32)],
        ),
        compiler_params=pltpu.CompilerParams(
            # i and j are independent -> shardable across v7x's 2 TensorCores;
            # k is the contraction axis carried by the VMEM accumulator.
            dimension_semantics=("parallel", "parallel", "arbitrary"),
            vmem_limit_bytes=plan.vmem_limit,
        ),
    )(feat_flat, plan.table)

    # (NC_pad, a_pad*rho_pad) -> (N, C, A, R).  The padding-removal slice does
    # materialise a small copy; the reshapes themselves are free.
    out = out[:NC].reshape(NC, a_pad, rho_pad)[:, :numangle, :numrho]
    return out.reshape(N, C, numangle, numrho).astype(feat.dtype)


class CDHT:
    """JAX/Pallas equivalent of the PyTorch C_dht module (forward only)."""
    # TODO(synk): backward (line_accum_backward) not implemented; forward only.

    def __init__(self, numAngle, numRho, compute_dtype=jnp.bfloat16):
        self.numAngle = numAngle
        self.numRho = numRho
        self.compute_dtype = compute_dtype
        self._plans = {}     # (N*C, H, W) -> _DHTPlan (holds the device table)

    def __call__(self, feat):
        N, C, H, W = feat.shape
        key = (N * C, H, W)
        plan = self._plans.get(key)
        if plan is None:
            plan = make_plan(N * C, H, W, self.numAngle, self.numRho,
                             self.compute_dtype)
            self._plans[key] = plan
        return dht_forward(feat, self.numAngle, self.numRho,
                           compute_dtype=self.compute_dtype, plan=plan)


# ----------------------------------------------------------------------------
# Reference + smoke test
# ----------------------------------------------------------------------------
def _reference(feat, numangle, numrho):
    """Scatter-add reference mirroring the CUDA line_accum_forward kernel."""
    feat = np.asarray(feat, dtype=np.float64)
    N, C, H, W = feat.shape
    r = build_rho_index_table(H, W, numangle, numrho)   # (A, HW)
    f = feat.reshape(N, C, H * W)
    out = np.zeros((N, C, numangle, numrho), dtype=np.float64)
    for a in range(numangle):
        for p in range(H * W):
            rho = int(r[a, p])
            if rho >= 0:
                out[:, :, a, rho] += f[:, :, p]
    return out


if __name__ == "__main__":
    key = jax.random.PRNGKey(0)
    N, C, H, W = 2, 4, 16, 16
    numAngle, numRho = 16, 32

    # Quantise the test input to multiples of 1/8: such values are exactly
    # representable in bf16 and all bin sums fit f32 exactly, so both compute
    # paths must reproduce the float64 scatter-add reference to rounding noise.
    feat = jnp.round(jax.random.normal(key, (N, C, H, W), jnp.float32) * 8.0) / 8.0

    ref = _reference(feat, numAngle, numRho)

    # Default (bf16 compute) path via the module wrapper.
    mod = CDHT(numAngle, numRho)
    out = jax.block_until_ready(mod(feat))
    assert out.shape == (N, C, numAngle, numRho), out.shape
    np.testing.assert_allclose(np.asarray(out, dtype=np.float64), ref,
                               rtol=1e-6, atol=1e-6)

    # f32 compute path (strict-parity option).
    out32 = jax.block_until_ready(
        dht_forward(feat, numAngle, numRho, compute_dtype=jnp.float32))
    np.testing.assert_allclose(np.asarray(out32, dtype=np.float64), ref,
                               rtol=1e-5, atol=1e-5)

    print("KERNEL_OK")
</pallas_src>

<mosaic_0001>
module attributes {stable_mosaic.version = 11 : i64} {
  func.func @_dht_kernel(%arg0: i32, %arg1: i32, %arg2: i32, %arg3: memref<8x256xbf16, #tpu.memory_space<vmem>>, %arg4: memref<1x256x4xi32, #tpu.memory_space<vmem>>, %arg5: memref<8x512xf32, #tpu.memory_space<vmem>>, %arg6: memref<8x512xf32, #tpu.memory_space<vmem>>) attributes {dimension_semantics = [#tpu.dimension_semantics<parallel>, #tpu.dimension_semantics<parallel>, #tpu.dimension_semantics<arbitrary>], iteration_bounds = array<i64: 1, 4, 1>, scalar_prefetch = 0 : i64, scratch_operands = 1 : i64, tpu.core_type = #tpu.core_type<tc>, window_params = [{transform_indices = @transform_0, window_bounds = array<i64: 8, 256>}, {transform_indices = @transform_1, window_bounds = array<i64: 1, 256, 4>}, {transform_indices = @transform_2, window_bounds = array<i64: 8, 512>}]} {
    %c0_i32 = arith.constant 0 : i32
    %0 = arith.cmpi eq, %arg2, %c0_i32 : i32
    %1 = arith.extui %0 : i1 to i32
    %c0_i32_0 = arith.constant 0 : i32
    %2 = arith.cmpi ne, %1, %c0_i32_0 : i32
    scf.if %2 {
      %cst_11 = arith.constant 0.000000e+00 : f32
      %39 = vector.broadcast %cst_11 : f32 to vector<8x512xf32>
      %c0_12 = arith.constant 0 : index
      %c0_13 = arith.constant 0 : index
      %40 = vector.load %arg6[%c0_12, %c0_13] : memref<8x512xf32, #tpu.memory_space<vmem>>, vector<8x512xf32>
      tpu.vector_store %arg6[%c0_12, %c0_13], %39 {strides = array<i32>} : memref<8x512xf32, #tpu.memory_space<vmem>>, vector<8x512xf32>,
    } else {
    }
    %c0 = arith.constant 0 : index
    %c0_1 = arith.constant 0 : index
    %3 = vector.load %arg3[%c0, %c0_1] : memref<8x256xbf16, #tpu.memory_space<vmem>>, vector<8x256xbf16>
    %c0_2 = arith.constant 0 : index
    %c0_3 = arith.constant 0 : index
    %c0_4 = arith.constant 0 : index
    %4 = vector.load %arg4[%c0_2, %c0_3, %c0_4] : memref<1x256x4xi32, #tpu.memory_space<vmem>>, vector<1x256x4xi32>
    %5 = vector.shape_cast %4 : vector<1x256x4xi32> to vector<256x4xi32>
    %6 = tpu.iota {dimensions = array<i32: 1>} : vector<256x128xi32>
    %7 = vector.extract_strided_slice %5 {offsets = [0, 0], sizes = [256, 1], strides = [1, 1]} : vector<256x4xi32> to vector<256x1xi32>
    %8 = vector.broadcast %7 : vector<256x1xi32> to vector<256x128xi32>
    %9 = arith.cmpi eq, %6, %8 : vector<256x128xi32>
    %10 = arith.extui %9 : vector<256x128xi1> to vector<256x128xi32>
    %11 = arith.sitofp %10 : vector<256x128xi32> to vector<256x128xf32>
    %12 = arith.truncf %11 : vector<256x128xf32> to vector<256x128xbf16>
    %13 = vector.extract_strided_slice %5 {offsets = [0, 1], sizes = [256, 1], strides = [1, 1]} : vector<256x4xi32> to vector<256x1xi32>
    %14 = vector.broadcast %13 : vector<256x1xi32> to vector<256x128xi32>
    %15 = arith.cmpi eq, %6, %14 : vector<256x128xi32>
    %16 = arith.extui %15 : vector<256x128xi1> to vector<256x128xi32>
    %17 = arith.sitofp %16 : vector<256x128xi32> to vector<256x128xf32>
    %18 = arith.truncf %17 : vector<256x128xf32> to vector<256x128xbf16>
    %19 = vector.extract_strided_slice %5 {offsets = [0, 2], sizes = [256, 1], strides = [1, 1]} : vector<256x4xi32> to vector<256x1xi32>
    %20 = vector.broadcast %19 : vector<256x1xi32> to vector<256x128xi32>
    %21 = arith.cmpi eq, %6, %20 : vector<256x128xi32>
    %22 = arith.extui %21 : vector<256x128xi1> to vector<256x128xi32>
    %23 = arith.sitofp %22 : vector<256x128xi32> to vector<256x128xf32>
    %24 = arith.truncf %23 : vector<256x128xf32> to vector<256x128xbf16>
    %25 = vector.extract_strided_slice %5 {offsets = [0, 3], sizes = [256, 1], strides = [1, 1]} : vector<256x4xi32> to vector<256x1xi32>
    %26 = vector.broadcast %25 : vector<256x1xi32> to vector<256x128xi32>
    %27 = arith.cmpi eq, %6, %26 : vector<256x128xi32>
    %28 = arith.extui %27 : vector<256x128xi1> to vector<256x128xi32>
    %29 = arith.sitofp %28 : vector<256x128xi32> to vector<256x128xf32>
    %30 = arith.truncf %29 : vector<256x128xf32> to vector<256x128xbf16>
    %31 = tpu.concatenate %12, %18, %24, %30 in 1 : vector<256x128xbf16>, vector<256x128xbf16>, vector<256x128xbf16>, vector<256x128xbf16> -> vector<256x512xbf16>
    %c0_5 = arith.constant 0 : index
    %c0_6 = arith.constant 0 : index
    %32 = vector.load %arg6[%c0_5, %c0_6] : memref<8x512xf32, #tpu.memory_space<vmem>>, vector<8x512xf32>
    %cst = arith.constant dense<0.000000e+00> : vector<8x512xf32>
    %33 = tpu.matmul %3, %31, %cst {dimension_numbers = #tpu.dot_dimension_numbers<[1], [0], [0], [1], [0, 0, 1, 1], [], []>} : vector<8x256xbf16>, vector<256x512xbf16>, vector<8x512xf32> -> vector<8x512xf32>
    %34 = arith.addf %32, %33 : vector<8x512xf32>
    %c0_7 = arith.constant 0 : index
    %c0_8 = arith.constant 0 : index
    %35 = vector.load %arg6[%c0_7, %c0_8] : memref<8x512xf32, #tpu.memory_space<vmem>>, vector<8x512xf32>
    tpu.vector_store %arg6[%c0_7, %c0_8], %34 {strides = array<i32>} : memref<8x512xf32, #tpu.memory_space<vmem>>, vector<8x512xf32>,
    %c0_i32_9 = arith.constant 0 : i32
    %36 = arith.cmpi eq, %arg2, %c0_i32_9 : i32
    %37 = arith.extui %36 : i1 to i32
    %c0_i32_10 = arith.constant 0 : i32
    %38 = arith.cmpi ne, %37, %c0_i32_10 : i32
    scf.if %38 {
      %c0_11 = arith.constant 0 : index
      %c0_12 = arith.constant 0 : index
      %39 = vector.load %arg6[%c0_11, %c0_12] : memref<8x512xf32, #tpu.memory_space<vmem>>, vector<8x512xf32>
      %c0_13 = arith.constant 0 : index
      %c0_14 = arith.constant 0 : index
      %40 = vector.load %arg5[%c0_13, %c0_14] : memref<8x512xf32, #tpu.memory_space<vmem>>, vector<8x512xf32>
      tpu.vector_store %arg5[%c0_13, %c0_14], %39 {strides = array<i32>} : memref<8x512xf32, #tpu.memory_space<vmem>>, vector<8x512xf32>,
    } else {
    }
    return
  }
  func.func @transform_0(%arg0: i32, %arg1: i32, %arg2: i32) -> (i32, i32) {
    %c0_i32 = arith.constant 0 : i32
    return %arg0, %arg2 : i32, i32
  }
  func.func @transform_1(%arg0: i32, %arg1: i32, %arg2: i32) -> (i32, i32, i32) {
    %c0_i32 = arith.constant 0 : i32
    %c0_i32_0 = arith.constant 0 : i32
    return %arg1, %arg2, %c0_i32 : i32, i32, i32
  }
  func.func @transform_2(%arg0: i32, %arg1: i32, %arg2: i32) -> (i32, i32) {
    %c0_i32 = arith.constant 0 : i32
    return %arg0, %arg1 : i32, i32
  }
}

</mosaic_0001>

<bundles_post_ra>
// kernel: tpu_custom_call.1
= control target key start
LH: loop header
LB: loop body
LE: loop exit
PB: predicated region body
PF: predicated region fallthrough
CT: control target
= control target key end

     0   :  { %7 = vsyncpa [#allocation4], 0  ;;  %s3001_s0 = inlined_call_operand.vmem [shape: bf16[8,256], index: 0, kind: input, shape index: {}]   ;;  %s3002_s1 = inlined_call_operand.vmem [shape: s32[4,256,4], index: 1, kind: input, shape index: {}]   ;;  %s3003_s2 = inlined_call_operand.hbm [shape: f32[8,2048], index: 2, kind: output, shape index: {}]  }
   0x1   :  { %9 = vsyncpa [#allocation4 + $0x1], 0  ;;  %s2132_s9 = smov 0   ;;  %s2134_s10 = smov 0  }
   0x2   :  { %s2136_s11 = smov 0   ;;  %s2138_s12 = smov 0  }
   0x3   :  { %s2140_s13 = smov 0   ;;  %s2142_s14 = smov 0  }
   0x4 LB: > { %s1792_s15 = sadd.s32 4294967295, %s2110_s14   ;;  %s1793_s16 = sadd.s32 4294967294, %s2110_s14   ;;  %s2110_s14 = sphi %s2142_s14, %s15_s14   ;;  %s2106_s13 = sphi %s2140_s13, %s3020_s13   ;;  %s2102_s12 = sphi %s2138_s12, %s3019_s12   ;;  %s2098_s11 = sphi %s2136_s11, %s3018_s11   ;;  %s2094_s10 = sphi %s2134_s10, %s3017_s10   ;;  %s2090_s9 = sphi %s2132_s9, %s3016_s9  }
   0x5   : > { %s30_s17 = sadd.s32 1, %s2106_s13  ;;  %s99_s18 = sadd.s32 1, %s2098_s11 }
   0x6   : > { %p32_p0 = scmp.ge.s32.totalorder %s30_s17, 4  ;;  %p109_p1 = scmp.ne.s32.totalorder %s2098_s11, %s2094_s10 }
   0x7   : > { %p110_p2 = scmp.eq.s32.totalorder %s1792_s15, 3  ;;  %p115_p3 = scmp.ne.s32.totalorder %s2094_s10, %s2090_s9 }
   0x8   : > { %s3022_s17 = smov (%p32_p0, %s30_s17), 0  ;;  %p116_p5 = scmp.eq.s32.totalorder %s1793_s16, 3 }
   0x9   : > { %p2172_p4 = por %p110_p2, %p109_p1  ;;  %s95_s20 = ssub.s32 %s2106_s13, %s3022_s17 }
   0xa   : > { %p1797_p6 = scmp.ge.s32.totalorder %s2110_s14, 1  ;;  %p97_p7 = scmp.eq.s32.totalorder %s95_s20, 0 }
   0xb   : > { %p2179_p8 = por %p116_p5, %p115_p3  ;;  %p160_p9 = scmp.lt.s32.totalorder %s2110_s14, 5 }
   0xc   : > { %s2185_s22 = scalar_select %p97_p7, %s2098_s11, %s99_s18  }
   0xd   : > { %p161_p10 = pnand %p1797_p6, %p160_p9 }
   0xf   : > { %164 = sbr.rel (%p161_p10) target bundleno = 645 (0x285), region = 28 }
  0x14   : > { %p206_p11 = scmp.lt.s32.totalorder %s2102_s12, 3  ;;  %v2112_v0 = vmov 0   ;;  %v2113_v33 = vmov 1   ;;  %v257_v34 = vlaneseq  ;;  %v2114_v37 = vmov 0.0   ;;  %s192_s30 = sand.u32 1, %s2094_s10  }
  0x15   : > { %1998 = vset.pattern.permute.xlu2 %v2112_v0  ;;  %1997 = vset.pattern.permute.xlu1 %v2112_v0  ;;  %s1798_s3 = sshll.u32 %s192_s30, 5  ;;  %s1935_s5 = sshll.u32 %s2102_s12, 5 }
  0x16   : > { %1996 = vset.pattern.permute.xlu0 %v2112_v0  ;;  %s207_s23 = scalar_select %p206_p11, %s2102_s12, 3  ;;  %v2324_v35 = vand.u32 127, %v257_v34 }
  0x17   : > { %s194_s4 = scalar_lea.vmem [#allocation3], %s1798_s3  ;;  %s1687_s8 = scalar_lea.hbm %s3003_s2, %s1935_s5 }
  0x18   : > { %s1934_s24 = sshll.u32 %s207_s23, 8  ;;  %s1689_s15 = sshll.u32 %s194_s4, 4  ;;  %s1690_s15 = int_to_ptr.vmem [resolvable:$true] %s1689_s15 }
  0x19   : > { %s2192_s27 = scalar_lea.vmem %s3002_s1, %s1934_s24  ;;  %s1691_s16 = sshll.u32 %s1687_s8, 4  ;;  %s1692_s16 = int_to_ptr.hbm [resolvable:$true] %s1691_s16 }
  0x1a   : > { %v2195_v1 = vld [vmem:[%s2192_s27 + $0x20] sm:$0xff]  ;;  %v2198_v2 = vld [vmem:[%s2192_s27 + $0x10] sm:$0xff]  ;;  %v2207_v4 = vld [vmem:[%s2192_s27 + $0x28] sm:$0xff]  ;;  %s1674_s18 = scalar_lea.sflag [#allocation4], %s192_s30  ;;  %s2046_s20 = sshra.s32 %s1692_s16, 4  ;;  %s2047_s20 = int_to_ptr.hbm [resolvable:$true] %s2046_s20 }
  0x1b   : > { %v2201_v3 = vld [vmem:[%s2192_s27] sm:$0xff]  ;;  %272 = vperm.xlu2 %1998, %v2195_v1   ;;  %266 = vperm.xlu1 %1997, %v2198_v2   ;;  %v2210_v5 = vld [vmem:[%s2192_s27 + $0x18] sm:$0xff]  ;;  %v2213_v6 = vld [vmem:[%s2192_s27 + $0x8] sm:$0xff]  ;;  %s2048_s23 = scalar_lea.hbm %s2047_s20, 32  ;;  %s2052_s25 = scalar_lea.hbm %s3003_s2, 128 }
  0x1c   : > { %260 = vperm.xlu0 %1996, %v2201_v3   ;;  %v2219_v7 = vld [vmem:[%s2192_s27 + $0x40] sm:$0xff]  ;;  %v2222_v8 = vld [vmem:[%s2192_s27 + $0x38] sm:$0xff]  ;;  %v2225_v9 = vld [vmem:[%s2192_s27 + $0x30] sm:$0xff]  ;;  %p2049_p12 = scmp.ne.s32.totalorder %s2047_s20, %s2048_s23  ;;  %p2053_p1 = scmp.lt.s32.totalorder %s2047_s20, %s3003_s2 }
  0x1d   : > { %v2231_v10 = vld [vmem:[%s2192_s27 + $0x58] sm:$0xff]  ;;  %v2234_v11 = vld [vmem:[%s2192_s27 + $0x50] sm:$0xff]  ;;  %v2237_v12 = vld [vmem:[%s2192_s27 + $0x48] sm:$0xff]  ;;  %p2054_p2 = scmp.lt.s32.totalorder %s2052_s25, %s2048_s23 }
  0x1e   : > { %v2243_v13 = vld [vmem:[%s2192_s27 + $0x70] sm:$0xff]  ;;  %v2246_v14 = vld [vmem:[%s2192_s27 + $0x68] sm:$0xff]  ;;  %v2249_v15 = vld [vmem:[%s2192_s27 + $0x60] sm:$0xff]  ;;  %p2050_p13 = pnand %p2049_p12, %p2172_p4 }
  0x1f   : > { %v2255_v16 = vld [vmem:[%s2192_s27 + $0x88] sm:$0xff]  ;;  %v2258_v17 = vld [vmem:[%s2192_s27 + $0x80] sm:$0xff]  ;;  %v2261_v18 = vld [vmem:[%s2192_s27 + $0x78] sm:$0xff]  ;;  %p2055_p3 = por %p2054_p2, %p2053_p1 }
  0x20   : > { %v2267_v19 = vld [vmem:[%s2192_s27 + $0xa0] sm:$0xff]  ;;  %v2270_v20 = vld [vmem:[%s2192_s27 + $0x98] sm:$0xff]  ;;  %v2273_v21 = vld [vmem:[%s2192_s27 + $0x90] sm:$0xff]  ;;  %p2051_p0 = pneg %p2050_p13 }
  0x21   : > { %v2279_v22 = vld [vmem:[%s2192_s27 + $0xb8] sm:$0xff]  ;;  %v2282_v23 = vld [vmem:[%s2192_s27 + $0xb0] sm:$0xff]  ;;  %v2285_v24 = vld [vmem:[%s2192_s27 + $0xa8] sm:$0xff] }
  0x22   : > { %v2291_v25 = vld [vmem:[%s2192_s27 + $0xd0] sm:$0xff]  ;;  %v2294_v26 = vld [vmem:[%s2192_s27 + $0xc8] sm:$0xff]  ;;  %v2297_v27 = vld [vmem:[%s2192_s27 + $0xc0] sm:$0xff]  ;;  %p2056_p5 = pnand %p2055_p3, %p2051_p0 }
  0x23   : > { %275 = vperm.xlu2 %1998, %v2207_v4   ;;  %269 = vperm.xlu1 %1997, %v2210_v5   ;;  %v2303_v28 = vld [vmem:[%s2192_s27 + $0xe8] sm:$0xff]  ;;  %v2306_v29 = vld [vmem:[%s2192_s27 + $0xe0] sm:$0xff]  ;;  %v2309_v30 = vld [vmem:[%s2192_s27 + $0xd8] sm:$0xff] }
  0x24   : > { %263 = vperm.xlu0 %1996, %v2213_v6   ;;  %3010 = vst [vmem:[#allocation6_spill] sm:$0xff] %v2303_v28  ;;  %v2315_v31 = vld [vmem:[%s2192_s27 + $0xf8] sm:$0xff]  ;;  %v2318_v32 = vld [vmem:[%s2192_s27 + $0xf0] sm:$0xff] }
  0x25   : > { %3011 = vst [vmem:[#allocation7_spill] sm:$0xff] %v2306_v29 }
  0x2b   : > { %284 = vperm.xlu2 %1998, %v2219_v7   ;;  %281 = vperm.xlu1 %1997, %v2222_v8  }
  0x2c   : > { %278 = vperm.xlu0 %1996, %v2225_v9  }
  0x33   : > { %293 = vperm.xlu2 %1998, %v2231_v10   ;;  %290 = vperm.xlu1 %1997, %v2234_v11  }
  0x34   : > { %287 = vperm.xlu0 %1996, %v2237_v12  }
  0x3b   : > { %302 = vperm.xlu2 %1998, %v2243_v13   ;;  %299 = vperm.xlu1 %1997, %v2246_v14  }
  0x3c   : > { %296 = vperm.xlu0 %1996, %v2249_v15  }
  0x43   : > { %311 = vperm.xlu2 %1998, %v2255_v16   ;;  %308 = vperm.xlu1 %1997, %v2258_v17  }
  0x44   : > { %305 = vperm.xlu0 %1996, %v2261_v18  }
  0x4b   : > { %320 = vperm.xlu2 %1998, %v2267_v19   ;;  %317 = vperm.xlu1 %1997, %v2270_v20  }
  0x4c   : > { %314 = vperm.xlu0 %1996, %v2273_v21  }
  0x53   : > { %329 = vperm.xlu2 %1998, %v2279_v22   ;;  %326 = vperm.xlu1 %1997, %v2282_v23  }
  0x54   : > { %323 = vperm.xlu0 %1996, %v2285_v24  }
  0x5b   : > { %338 = vperm.xlu2 %1998, %v2291_v25   ;;  %335 = vperm.xlu1 %1997, %v2294_v26  }
  0x5c   : > { %332 = vperm.xlu0 %1996, %v2297_v27  }
  0x63   : > { %347 = vperm.xlu2 %1998, %v2303_v28   ;;  %344 = vperm.xlu1 %1997, %v2306_v29  }
  0x64   : > { %341 = vperm.xlu0 %1996, %v2309_v30  }
  0x6b   : > { %1999 = vset.pattern.permute.xlu2 %v2113_v33  ;;  %353 = vperm.xlu1 %1997, %v2315_v31  }
  0x6c   : > { %350 = vperm.xlu0 %1996, %v2318_v32   ;;  %484 = vperm.xlu2 %1999, %v2201_v3  }
  0x73   : > { %2001 = vset.pattern.permute.xlu1 %v2113_v33 }
  0x74   : > { %2000 = vset.pattern.permute.xlu0 %v2113_v33  ;;  %490 = vperm.xlu1 %2001, %v2198_v2  }
  0x75   : > { %493 = vperm.xlu2 %1999, %v2210_v5   ;;  %487 = vperm.xlu0 %2000, %v2213_v6   ;;  %v273_v36 = vpop.permute.xlu2 %272 }
  0x76   : > { %vm359_vm0 = vcmp.eq.s32.totalorder %v2324_v35, %v273_v36 }
  0x77   : > { %v1805_v38 = vsel %vm359_vm0, 1.0, %v2114_v37 }
  0x78   : > { %v455_v39 = vpack.c.bf16 %v1805_v38, %v1805_v38 }
  0x7a   : > { %v2335_v42 = vunpack.c.l.b16 %v455_v39 }
  0x7c   : > { %496 = vperm.xlu1 %2001, %v2195_v1  }
  0x7d   : > { %499 = vperm.xlu2 %1999, %v2207_v4   ;;  %502 = vperm.xlu0 %2000, %v2225_v9   ;;  %v276_v40 = vpop.permute.xlu2 %275 }
  0x7e   : > { %vm360_vm1 = vcmp.eq.s32.totalorder %v2324_v35, %v276_v40 }
  0x7f   : > { %v1806_v41 = vsel %vm360_vm1, 1.0, %v2114_v37 }
  0x80   : > { %v456_v43 = vpack.c.bf16 %v1806_v41, %v1806_v41 }
  0x82   : > { %v2337_v44 = vunpack.c.l.b16 %v456_v43 }
  0x84   : > { %505 = vperm.xlu1 %2001, %v2222_v8  }
  0x85   : > { %508 = vperm.xlu2 %1999, %v2219_v7   ;;  %511 = vperm.xlu0 %2000, %v2237_v12   ;;  %v2344_v46 = vpop.permute.xlu2 %284 }
  0x86   : > { %vm363_vm11 = vcmp.eq.s32.totalorder %v2324_v35, %v2344_v46 }
  0x8c   : > { %514 = vperm.xlu1 %2001, %v2234_v11  }
  0x8d   : > { %517 = vperm.xlu2 %1999, %v2231_v10   ;;  %520 = vperm.xlu0 %2000, %v2249_v15   ;;  %v294_v47 = vpop.permute.xlu2 %293  ;;  %v2349_v48 = vpop.permute.xlu1 %266 }
  0x8e   : > { %v2351_v49 = vpop.permute.xlu0 %260  ;;  %vm366_vm9 = vcmp.eq.s32.totalorder %v2324_v35, %v294_v47  ;;  %vm357_vm15 = vcmp.eq.s32.totalorder %v2324_v35, %v2349_v48 }
  0x8f   : > { %vm355_vm0 = vcmp.eq.s32.totalorder %v2324_v35, %v2351_v49 }
  0x94   : > { %523 = vperm.xlu1 %2001, %v2246_v14  }
  0x95   : > { %526 = vperm.xlu2 %1999, %v2243_v13   ;;  %529 = vperm.xlu0 %2000, %v2261_v18   ;;  %v303_v50 = vpop.permute.xlu2 %302  ;;  %v2356_v51 = vpop.permute.xlu1 %269 }
  0x96   : > { %v2358_v52 = vpop.permute.xlu0 %263  ;;  %vm369_vm3 = vcmp.eq.s32.totalorder %v2324_v35, %v303_v50  ;;  %vm358_vm14 = vcmp.eq.s32.totalorder %v2324_v35, %v2356_v51 }
  0x97   : > { %v1815_v63 = vsel %vm369_vm3, 1.0, %v2114_v37  ;;  %vm356_vm1 = vcmp.eq.s32.totalorder %v2324_v35, %v2358_v52 }
  0x98   : > { %v465_v40 = vpack.c.bf16 %v1815_v63, %v1815_v63 }
  0x9c   : > { %532 = vperm.xlu1 %2001, %v2258_v17  }
  0x9d   : > { %535 = vperm.xlu2 %1999, %v2255_v16   ;;  %538 = vperm.xlu0 %2000, %v2273_v21   ;;  %v312_v53 = vpop.permute.xlu2 %311  ;;  %v2363_v54 = vpop.permute.xlu1 %281 }
  0x9e   : > { %v2365_v55 = vpop.permute.xlu0 %278  ;;  %vm372_vm2 = vcmp.eq.s32.totalorder %v2324_v35, %v312_v53  ;;  %vm362_vm12 = vcmp.eq.s32.totalorder %v2324_v35, %v2363_v54 }
  0x9f   : > { %v1818_v62 = vsel %vm372_vm2, 1.0, %v2114_v37  ;;  %vm361_vm13 = vcmp.eq.s32.totalorder %v2324_v35, %v2365_v55 }
  0xa0   : > { %v468_v34 = vpack.c.bf16 %v1818_v62, %v1818_v62  ;;  %v1807_v47 = vsel %vm361_vm13, 1.0, %v2114_v37 }
  0xa1   : > { %v457_v55 = vpack.c.bf16 %v1807_v47, %v1807_v47 }
  0xa2   : > { %v2396_v62 = vunpack.c.l.b16 %v468_v34 }
  0xa4   : > { %541 = vperm.xlu1 %2001, %v2270_v20  }
  0xa5   : > { %544 = vperm.xlu2 %1999, %v2267_v19   ;;  %547 = vperm.xlu0 %2000, %v2285_v24   ;;  %v2370_v56 = vpop.permute.xlu2 %320  ;;  %v291_v57 = vpop.permute.xlu1 %290 }
  0xa6   : > { %v288_v58 = vpop.permute.xlu0 %287  ;;  %vm365_vm7 = vcmp.eq.s32.totalorder %v2324_v35, %v291_v57  ;;  %v1201_v57 = vunpack.c.l.b16 %v465_v40  ;;  %vm375_vm13 = vcmp.eq.s32.totalorder %v2324_v35, %v2370_v56 }
  0xa7   : > { %vm364_vm10 = vcmp.eq.s32.totalorder %v2324_v35, %v288_v58 }
  0xac   : > { %550 = vperm.xlu1 %2001, %v2282_v23  }
  0xad   : > { %553 = vperm.xlu2 %1999, %v2279_v22   ;;  %556 = vperm.xlu0 %2000, %v2297_v27   ;;  %v2375_v59 = vpop.permute.xlu2 %329  ;;  %v300_v60 = vpop.permute.xlu1 %299 }
  0xae   : > { %v297_v61 = vpop.permute.xlu0 %296  ;;  %vm368_vm4 = vcmp.eq.s32.totalorder %v2324_v35, %v300_v60 }
  0xaf   : > { %vm367_vm5 = vcmp.eq.s32.totalorder %v2324_v35, %v297_v61  ;;  %v1814_v36 = vsel %vm368_vm4, 1.0, %v2114_v37 }
  0xb0   : > { %v1813_v38 = vsel %vm367_vm5, 1.0, %v2114_v37  ;;  %v464_v53 = vpack.c.bf16 %v1814_v36, %v1814_v36 }
  0xb1   : > { %v463_v60 = vpack.c.bf16 %v1813_v38, %v1813_v38 }
  0xb2   : > { %v1200_v36 = vunpack.c.l.b16 %v464_v53  ;;  %v1809_v53 = vsel %vm363_vm11, 1.0, %v2114_v37  ;;  %vm378_vm11 = vcmp.eq.s32.totalorder %v2324_v35, %v2375_v59 }
  0xb3   : > { %v1199_v38 = vunpack.c.l.b16 %v463_v60 }
  0xb4   : > { %559 = vperm.xlu1 %2001, %v2294_v26  }
  0xb5   : > { %562 = vperm.xlu2 %1999, %v2291_v25   ;;  %565 = vperm.xlu0 %2000, %v2309_v30   ;;  %v2386_v0 = vpop.permute.xlu2 %338  ;;  %v309_v33 = vpop.permute.xlu1 %308 }
  0xb6   : > { %vm371_vm6 = vcmp.eq.s32.totalorder %v2324_v35, %v309_v33  ;;  %v306_v39 = vpop.permute.xlu0 %305  ;;  %v1811_v33 = vsel %vm365_vm7, 1.0, %v2114_v37  ;;  %vm381_vm7 = vcmp.eq.s32.totalorder %v2324_v35, %v2386_v0 }
  0xb7   : > { %v1817_v41 = vsel %vm371_vm6, 1.0, %v2114_v37  ;;  %vm370_vm8 = vcmp.eq.s32.totalorder %v2324_v35, %v306_v39  ;;  %v1812_v39 = vsel %vm366_vm9, 1.0, %v2114_v37  ;;  %v461_v34 = vpack.c.bf16 %v1811_v33, %v1811_v33 }
  0xb8   : > { %v467_v43 = vpack.c.bf16 %v1817_v41, %v1817_v41  ;;  %v1816_v50 = vsel %vm370_vm8, 1.0, %v2114_v37 }
  0xb9   : > { %v466_v61 = vpack.c.bf16 %v1816_v50, %v1816_v50  ;;  %v1197_v60 = vunpack.c.l.b16 %v461_v34 }
  0xba   : > { %v2399_v45 = vunpack.c.l.b16 %v467_v43  ;;  %v1810_v43 = vsel %vm364_vm10, 1.0, %v2114_v37 }
  0xbb   : > { %v1202_v63 = vunpack.c.l.b16 %v466_v61  ;;  %v462_v61 = vpack.c.bf16 %v1812_v39, %v1812_v39  ;;  %v460_v33 = vpack.c.bf16 %v1810_v43, %v1810_v43  ;;  %v459_v39 = vpack.c.bf16 %v1809_v53, %v1809_v53 }
  0xbc   : > { %568 = vperm.xlu1 %2001, %v2306_v29  }
  0xbd   : > { %571 = vperm.xlu2 %1999, %v2303_v28   ;;  %574 = vperm.xlu0 %2000, %v2318_v32   ;;  %v2410_v58 = vpop.permute.xlu2 %347  ;;  %v2412_v40 = vpop.permute.xlu1 %317  ;;  %v1226_v41 = vpack.c.b16 %v1202_v63, %v1201_v57  ;;  %v1225_v57 = vpack.c.b16 %v1200_v36, %v1199_v38  ;;  %v1808_v63 = vsel %vm362_vm12, 1.0, %v2114_v37  ;;  %v1198_v29 = vunpack.c.l.b16 %v462_v61 }
  0xbe   : > { %v2415_v50 = vpop.permute.xlu0 %314  ;;  %v458_v54 = vpack.c.bf16 %v1808_v63, %v1808_v63  ;;  %v2115_v28 = vmov 2   ;;  %v1195_v43 = vunpack.c.l.b16 %v459_v39  ;;  %v1193_v61 = vunpack.c.l.b16 %v457_v55 }
  0xbf   : > { %1550 = vmatpush.bf16.msra.mxu0 %v1226_v41  ;;  %v1196_v41 = vunpack.c.l.b16 %v460_v33  ;;  %v1224_v34 = vpack.c.b16 %v1198_v29, %v1197_v60  ;;  %v1804_v29 = vsel %vm358_vm14, 1.0, %v2114_v37  ;;  %v1801_v60 = vsel %vm355_vm0, 1.0, %v2114_v37 }
  0xc0   : > { %v1194_v47 = vunpack.c.l.b16 %v458_v54  ;;  %v1802_v33 = vsel %vm356_vm1, 1.0, %v2114_v37  ;;  %v451_v63 = vpack.c.bf16 %v1801_v60, %v1801_v60  ;;  %vm384_vm3 = vcmp.eq.s32.totalorder %v2324_v35, %v2410_v58 }
  0xc1   : > { %v1223_v53 = vpack.c.b16 %v1196_v41, %v1195_v43  ;;  %v452_v54 = vpack.c.bf16 %v1802_v33, %v1802_v33  ;;  %vm374_vm14 = vcmp.eq.s32.totalorder %v2324_v35, %v2412_v40 }
  0xc2   : > { %v1222_v51 = vpack.c.b16 %v1194_v47, %v1193_v61  ;;  %v1187_v41 = vunpack.c.l.b16 %v451_v63 }
  0xc3   : > { %1551 = vmatpush.bf16.msra.mxu0 %v1225_v57 }
  0xc4   : > { %577 = vperm.xlu1 %2001, %v2315_v31  }
  0xc5   : > { %2002 = vset.pattern.permute.xlu2 %v2115_v28  ;;  %2003 = vset.pattern.permute.xlu0 %v2115_v28  ;;  %v2430_v46 = vpop.permute.xlu1 %326 }
  0xc6   : > { %708 = vperm.xlu2 %2002, %v2201_v3   ;;  %711 = vperm.xlu0 %2003, %v2213_v6   ;;  %v2434_v36 = vpop.permute.xlu0 %323  ;;  %v2436_v38 = vpop.permute.xlu2 %484  ;;  %v1803_v3 = vsel %vm357_vm15, 1.0, %v2114_v37  ;;  %v454_v6 = vpack.c.bf16 %v1804_v29, %v1804_v29  ;;  %vm377_vm10 = vcmp.eq.s32.totalorder %v2324_v35, %v2430_v46  ;;  %v1824_v46 = vsel %vm378_vm11, 1.0, %v2114_v37 }
  0xc7   : > { %1552 = vmatpush.bf16.msra.mxu0 %v1224_v34  ;;  %v453_v52 = vpack.c.bf16 %v1803_v3, %v1803_v3  ;;  %v1188_v34 = vunpack.c.l.b16 %v452_v54  ;;  %vm376_vm12 = vcmp.eq.s32.totalorder %v2324_v35, %v2434_v36  ;;  %v474_v36 = vpack.c.bf16 %v1824_v46, %v1824_v46 }
  0xc8   : > { %v1190_v39 = vunpack.c.l.b16 %v454_v6  ;;  %vm373_vm15 = vcmp.eq.s32.totalorder %v2324_v35, %v2415_v50 }
  0xc9   : > { %v1189_v55 = vunpack.c.l.b16 %v453_v52  ;;  %v1219_v61 = vpack.c.b16 %v1188_v34, %v1187_v41  ;;  %v1827_v52 = vsel %vm381_vm7, 1.0, %v2114_v37 }
  0xcb   : > { %1553 = vmatpush.bf16.msra.mxu0 %v1223_v53  ;;  %v1220_v43 = vpack.c.b16 %v1190_v39, %v1189_v55 }
  0xcc   : > { %2004 = vset.pattern.permute.xlu1 %v2115_v28 }
  0xcd   : > { %714 = vperm.xlu1 %2004, %v2198_v2   ;;  %v336_v48 = vpop.permute.xlu1 %335  ;;  %v3012_v2 = vpack.c.b16 %v2337_v44, %v2335_v42 }
  0xce   : > { %717 = vperm.xlu2 %2002, %v2210_v5   ;;  %726 = vperm.xlu0 %2003, %v2225_v9   ;;  %v333_v49 = vpop.permute.xlu0 %332  ;;  %vm380_vm8 = vcmp.eq.s32.totalorder %v2324_v35, %v336_v48  ;;  %v477_v48 = vpack.c.bf16 %v1827_v52, %v1827_v52  ;;  %v1819_v52 = vsel %vm373_vm15, 1.0, %v2114_v37 }
  0xcf   : > { %v2454_v57 = vpop.permute.xlu2 %493  ;;  %1554 = vmatpush.bf16.msra.mxu0 %v1222_v51  ;;  %vm379_vm9 = vcmp.eq.s32.totalorder %v2324_v35, %v333_v49  ;;  %v1826_v0 = vsel %vm380_vm8, 1.0, %v2114_v37 }
  0xd0   : > { %v1825_v55 = vsel %vm379_vm9, 1.0, %v2114_v37 }
  0xd3   : > { %1555 = vmatpush.bf16.msra.mxu0 %v3012_v2 }
  0xd5   : > { %720 = vperm.xlu1 %2004, %v2195_v1   ;;  %v345_v5 = vpop.permute.xlu1 %344 }
  0xd6   : > { %723 = vperm.xlu2 %2002, %v2207_v4   ;;  %735 = vperm.xlu0 %2003, %v2237_v12   ;;  %v342_v9 = vpop.permute.xlu0 %341  ;;  %vm383_vm2 = vcmp.eq.s32.totalorder %v2324_v35, %v345_v5  ;;  %v476_v5 = vpack.c.bf16 %v1826_v0, %v1826_v0 }
  0xd7   : > { %v2462_v47 = vpop.permute.xlu2 %499  ;;  %1556 = vmatpush.bf16.msra.mxu0 %v1220_v43  ;;  %v1829_v42 = vsel %vm383_vm2, 1.0, %v2114_v37  ;;  %vm382_vm5 = vcmp.eq.s32.totalorder %v2324_v35, %v342_v9  ;;  %v475_v43 = vpack.c.bf16 %v1825_v55, %v1825_v55 }
  0xd8   : > { %v479_v29 = vpack.c.bf16 %v1829_v42, %v1829_v42  ;;  %v1828_v6 = vsel %vm382_vm5, 1.0, %v2114_v37  ;;  %v1213_v42 = vunpack.c.l.b16 %v477_v48 }
  0xd9   : > { %v478_v39 = vpack.c.bf16 %v1828_v6, %v1828_v6  ;;  %v1821_v6 = vsel %vm375_vm13, 1.0, %v2114_v37  ;;  %vm584_vm13 = vcmp.eq.s32.totalorder %v2324_v35, %v2462_v47 }
  0xda   : > { %v1215_v63 = vunpack.c.l.b16 %v479_v29  ;;  %v471_v40 = vpack.c.bf16 %v1821_v6, %v1821_v6 }
  0xdb   : > { %1557 = vmatpush.bf16.msra.mxu0 %v1219_v61  ;;  %v1214_v9 = vunpack.c.l.b16 %v478_v39  ;;  %v469_v39 = vpack.c.bf16 %v1819_v52, %v1819_v52 }
  0xdc   : > { %v1207_v55 = vunpack.c.l.b16 %v471_v40 }
  0xdd   : > { %729 = vperm.xlu1 %2004, %v2222_v8   ;;  %v354_v1 = vpop.permute.xlu1 %353  ;;  %v1830_v8 = vsel %vm384_vm3, 1.0, %v2114_v37  ;;  %v1232_v59 = vpack.c.b16 %v1214_v9, %v1213_v42 }
  0xde   : > { %vm386_vm4 = vcmp.eq.s32.totalorder %v2324_v35, %v354_v1  ;;  %732 = vperm.xlu2 %2002, %v2219_v7   ;;  %744 = vperm.xlu0 %2003, %v2249_v15   ;;  %v351_v4 = vpop.permute.xlu0 %350  ;;  %v480_v60 = vpack.c.bf16 %v1830_v8, %v1830_v8  ;;  %v1823_v1 = vsel %vm377_vm10, 1.0, %v2114_v37  ;;  %v1211_v8 = vunpack.c.l.b16 %v475_v43 }
  0xdf   : > { %v1832_v12 = vsel %vm386_vm4, 1.0, %v2114_v37  ;;  %vm385_vm6 = vcmp.eq.s32.totalorder %v2324_v35, %v351_v4  ;;  %v2475_v44 = vpop.permute.xlu2 %508  ;;  %v473_v4 = vpack.c.bf16 %v1823_v1, %v1823_v1  ;;  %v1205_v43 = vunpack.c.l.b16 %v469_v39 }
  0xe0   : > { %v482_v58 = vpack.c.bf16 %v1832_v12, %v1832_v12  ;;  %v1831_v53 = vsel %vm385_vm6, 1.0, %v2114_v37  ;;  %v1216_v49 = vunpack.c.l.b16 %v480_v60  ;;  %v1212_v12 = vunpack.c.l.b16 %v476_v5 }
  0xe1   : > { %v481_v3 = vpack.c.bf16 %v1831_v53, %v1831_v53  ;;  %v3013_v1 = vpack.c.b16 %v2396_v62, %v2399_v45  ;;  %vm587_vm8 = vcmp.eq.s32.totalorder %v2324_v35, %v2475_v44 }
  0xe2   : > { %v1218_v51 = vunpack.c.l.b16 %v482_v58  ;;  %v1233_v61 = vpack.c.b16 %v1216_v49, %v1215_v63  ;;  %v1822_v58 = vsel %vm376_vm12, 1.0, %v2114_v37  ;;  %v1231_v60 = vpack.c.b16 %v1212_v12, %v1211_v8 }
  0xe3   : > { %v1217_v33 = vunpack.c.l.b16 %v481_v3  ;;  %v1210_v63 = vunpack.c.l.b16 %v474_v36 }
  0xe5   : > { %738 = vperm.xlu1 %2004, %v2234_v11   ;;  %v1234_v54 = vpack.c.b16 %v1218_v51, %v1217_v33  ;;  %v1209_v51 = vunpack.c.l.b16 %v473_v4  ;;  %v1820_v33 = vsel %vm374_vm14, 1.0, %v2114_v37  ;;  %vm582_vm14 = vcmp.eq.s32.totalorder %v2324_v35, %v2454_v57 }
  0xe6   : > { %741 = vperm.xlu2 %2002, %v2231_v10   ;;  %753 = vperm.xlu0 %2003, %v2261_v18   ;;  %v2490_v2 = vpop.permute.xlu1 %490  ;;  %v470_v50 = vpack.c.bf16 %v1820_v33, %v1820_v33 }
  0xe7   : > { %v2494_v41 = vpop.permute.xlu2 %517  ;;  %1563 = vmatpush.bf16.msra.mxu1 %v1234_v54  ;;  %v2496_v34 = vpop.permute.xlu0 %487  ;;  %v1230_v0 = vpack.c.b16 %v1210_v63, %v1209_v51  ;;  %vm581_vm15 = vcmp.eq.s32.totalorder %v2324_v35, %v2490_v2 }
  0xe8   : > { %v1206_v5 = vunpack.c.l.b16 %v470_v50  ;;  %vm590_vm3 = vcmp.eq.s32.totalorder %v2324_v35, %v2494_v41  ;;  %v1835_v57 = vsel %vm581_vm15, 1.0, %v2114_v37 }
  0xeb   : > { %1564 = vmatpush.bf16.msra.mxu1 %v1233_v61  ;;  %v1228_v61 = vpack.c.b16 %v1206_v5, %v1205_v43 }
  0xed   : > { %747 = vperm.xlu1 %2004, %v2246_v14  }
  0xee   : > { %750 = vperm.xlu2 %2002, %v2243_v13   ;;  %762 = vperm.xlu0 %2003, %v2273_v21   ;;  %v2510_v53 = vpop.permute.xlu1 %496  ;;  %v472_v21 = vpack.c.bf16 %v1822_v58, %v1822_v58 }
  0xef   : > { %v527_v29 = vpop.permute.xlu2 %526  ;;  %1565 = vmatpush.bf16.msra.mxu1 %v1232_v59  ;;  %v2516_v3 = vpop.permute.xlu0 %502  ;;  %v1844_v59 = vsel %vm590_vm3, 1.0, %v2114_v37  ;;  %vm583_vm12 = vcmp.eq.s32.totalorder %v2324_v35, %v2510_v53 }
  0xf0   : > { %v1208_v54 = vunpack.c.l.b16 %v472_v21  ;;  %vm593_vm0 = vcmp.eq.s32.totalorder %v2324_v35, %v527_v29  ;;  %v686_v40 = vpack.c.bf16 %v1844_v59, %v1844_v59  ;;  %vm585_vm10 = vcmp.eq.s32.totalorder %v2324_v35, %v2516_v3 }
  0xf1   : > { %v1847_v42 = vsel %vm593_vm0, 1.0, %v2114_v37  ;;  %v1837_v53 = vsel %vm583_vm12, 1.0, %v2114_v37  ;;  %vm579_vm0 = vcmp.eq.s32.totalorder %v2324_v35, %v2436_v38 }
  0xf2   : > { %v1229_v9 = vpack.c.b16 %v1208_v54, %v1207_v55  ;;  %v1833_v38 = vsel %vm579_vm0, 1.0, %v2114_v37 }
  0xf3   : > { %1566 = vmatpush.bf16.msra.mxu1 %v1231_v60  ;;  %v2116_v60 = vmov 3  }
  0xf5   : > { %756 = vperm.xlu1 %2004, %v2258_v17  }
  0xf6   : > { %759 = vperm.xlu2 %2002, %v2255_v16   ;;  %771 = vperm.xlu0 %2003, %v2285_v24   ;;  %v2527_v56 = vpop.permute.xlu1 %505 }
  0xf7   : > { %v536_v48 = vpop.permute.xlu2 %535  ;;  %1567 = vmatpush.bf16.msra.mxu1 %v1230_v0  ;;  %v512_v49 = vpop.permute.xlu0 %511  ;;  %vm586_vm11 = vcmp.eq.s32.totalorder %v2324_v35, %v2527_v56 }
  0xf8   : > { %vm596_vm6 = vcmp.eq.s32.totalorder %v2324_v35, %v536_v48  ;;  %vm588_vm7 = vcmp.eq.s32.totalorder %v2324_v35, %v512_v49  ;;  %v1841_v48 = vsel %vm587_vm8, 1.0, %v2114_v37  ;;  %v1840_v3 = vsel %vm586_vm11, 1.0, %v2114_v37 }
  0xf9   : > { %v1850_v41 = vsel %vm596_vm6, 1.0, %v2114_v37  ;;  %v1842_v50 = vsel %vm588_vm7, 1.0, %v2114_v37 }
  0xfa   : > { %v692_v63 = vpack.c.bf16 %v1850_v41, %v1850_v41  ;;  %v684_v5 = vpack.c.bf16 %v1842_v50, %v1842_v50  ;;  %v1836_v41 = vsel %vm582_vm14, 1.0, %v2114_v37 }
  0xfb   : > { %1568 = vmatpush.bf16.msra.mxu1 %v1229_v9  ;;  %v678_v2 = vpack.c.bf16 %v1836_v41, %v1836_v41 }
  0xfd   : > { %765 = vperm.xlu1 %2004, %v2270_v20   ;;  %v689_v20 = vpack.c.bf16 %v1847_v42, %v1847_v42  ;;  %v1286_v50 = vunpack.c.l.b16 %v678_v2 }
  0xfe   : > { %768 = vperm.xlu2 %2002, %v2267_v19   ;;  %780 = vperm.xlu0 %2003, %v2297_v27   ;;  %v515_v16 = vpop.permute.xlu1 %514 }
  0xff   : > { %v2532_v17 = vpop.permute.xlu2 %544  ;;  %1569 = vmatpush.bf16.msra.mxu1 %v1228_v61  ;;  %v521_v24 = vpop.permute.xlu0 %520  ;;  %vm589_vm4 = vcmp.eq.s32.totalorder %v2324_v35, %v515_v16  ;;  %v1297_v36 = vunpack.c.l.b16 %v689_v20  ;;  %v1839_v61 = vsel %vm585_vm10, 1.0, %v2114_v37  ;;  %v2581_v16 = vunpack.c.l.b16 %v692_v63 }
 0x100   : > { %vm591_vm1 = vcmp.eq.s32.totalorder %v2324_v35, %v521_v24  ;;  %v1843_v58 = vsel %vm589_vm4, 1.0, %v2114_v37  ;;  %v683_v24 = vpack.c.bf16 %v1841_v48, %v1841_v48  ;;  %v681_v42 = vpack.c.bf16 %v1839_v61, %v1839_v61 }
 0x101   : > { %v685_v51 = vpack.c.bf16 %v1843_v58, %v1843_v58  ;;  %v1292_v20 = vunpack.c.l.b16 %v684_v5  ;;  %v675_v63 = vpack.c.bf16 %v1833_v38, %v1833_v38 }
 0x102   : > { %v1289_v59 = vunpack.c.l.b16 %v681_v42 }
 0x103   : > { %1570 = vmatpush.bf16.msra.mxu1 %v3013_v1  ;;  %v1293_v43 = vunpack.c.l.b16 %v685_v51  ;;  %v1294_v1 = vunpack.c.l.b16 %v686_v40 }
 0x105   : > { %774 = vperm.xlu1 %2004, %v2282_v23  }
 0x106   : > { %777 = vperm.xlu2 %2002, %v2279_v22   ;;  %789 = vperm.xlu0 %2003, %v2309_v30   ;;  %v524_v19 = vpop.permute.xlu1 %523  ;;  %v1845_v22 = vsel %vm591_vm1, 1.0, %v2114_v37  ;;  %vm580_vm1 = vcmp.eq.s32.totalorder %v2324_v35, %v2496_v34 }
 0x107   : > { %vm592_vm2 = vcmp.eq.s32.totalorder %v2324_v35, %v524_v19  ;;  %v2544_v46 = vpop.permute.xlu2 %553  ;;  %v530_v4 = vpop.permute.xlu0 %529  ;;  %v687_v29 = vpack.c.bf16 %v1845_v22, %v1845_v22  ;;  %v682_v19 = vpack.c.bf16 %v1840_v3, %v1840_v3 }
 0x108   : > { %v1846_v45 = vsel %vm592_vm2, 1.0, %v2114_v37  ;;  %vm594_vm5 = vcmp.eq.s32.totalorder %v2324_v35, %v530_v4  ;;  %vm602_vm11 = vcmp.eq.s32.totalorder %v2324_v35, %v2544_v46 }
 0x109   : > { %v1848_v62 = vsel %vm594_vm5, 1.0, %v2114_v37  ;;  %v688_v12 = vpack.c.bf16 %v1846_v45, %v1846_v45  ;;  %v1295_v0 = vunpack.c.l.b16 %v687_v29  ;;  %v1320_v45 = vpack.c.b16 %v1294_v1, %v1293_v43 }
 0x10a   : > { %v690_v8 = vpack.c.bf16 %v1848_v62, %v1848_v62  ;;  %v3014_v62 = vld [vmem:[#allocation6_spill] sm:$0xff]  ;;  %v1290_v58 = vunpack.c.l.b16 %v682_v19 }
 0x10b   : > { %v1296_v21 = vunpack.c.l.b16 %v688_v12 }
 0x10c   : > { %v1298_v6 = vunpack.c.l.b16 %v690_v8  ;;  %v1291_v8 = vunpack.c.l.b16 %v683_v24 }
 0x10d   : > { %783 = vperm.xlu1 %2004, %v2294_v26   ;;  %v1321_v9 = vpack.c.b16 %v1296_v21, %v1295_v0  ;;  %v1318_v21 = vpack.c.b16 %v1290_v58, %v1289_v59 }
 0x10e   : > { %786 = vperm.xlu2 %2002, %v2291_v25   ;;  %2007 = vset.pattern.permute.xlu0 %v2116_v60  ;;  %v533_v33 = vpop.permute.xlu1 %532  ;;  %v1322_v52 = vpack.c.b16 %v1298_v6, %v1297_v36  ;;  %v1319_v36 = vpack.c.b16 %v1292_v20, %v1291_v8  ;;  %v677_v6 = vpack.c.bf16 %v1835_v57, %v1835_v57 }
 0x10f   : > { %vm595_vm9 = vcmp.eq.s32.totalorder %v2324_v35, %v533_v33  ;;  %v2565_v39 = vpop.permute.xlu2 %562  ;;  %1022 = vperm.xlu0 %2007, %v2318_v32   ;;  %v2568_v54 = vpop.permute.xlu0 %538  ;;  %v1834_v33 = vsel %vm580_vm1, 1.0, %v2114_v37 }
 0x110   : > { %v1849_v55 = vsel %vm595_vm9, 1.0, %v2114_v37  ;;  %1576 = vmatpush.bf16.msra.mxu2 %v1322_v52  ;;  %v1285_v0 = vunpack.c.l.b16 %v677_v6  ;;  %vm605_vm7 = vcmp.eq.s32.totalorder %v2324_v35, %v2565_v39  ;;  %vm597_vm15 = vcmp.eq.s32.totalorder %v2324_v35, %v2568_v54 }
 0x111   : > { %v691_v49 = vpack.c.bf16 %v1849_v55, %v1849_v55  ;;  %v676_v55 = vpack.c.bf16 %v1834_v33, %v1834_v33  ;;  %v1859_v59 = vsel %vm605_vm7, 1.0, %v2114_v37  ;;  %v1851_v54 = vsel %vm597_vm15, 1.0, %v2114_v37 }
 0x112   : > { %v701_v39 = vpack.c.bf16 %v1859_v59, %v1859_v59 }
 0x113   : > { %v2583_v56 = vunpack.c.l.b16 %v691_v49  ;;  %v1283_v49 = vunpack.c.l.b16 %v675_v63  ;;  %v1284_v5 = vunpack.c.l.b16 %v676_v55 }
 0x114   : > { %1577 = vmatpush.bf16.msra.mxu2 %v1321_v9  ;;  %v3015_v9 = vld [vmem:[#allocation7_spill] sm:$0xff] }
 0x115   : > { %2005 = vset.pattern.permute.xlu1 %v2116_v60  ;;  %v1323_v44 = vpack.c.b16 %v2581_v16, %v2583_v56  ;;  %v1315_v3 = vpack.c.b16 %v1284_v5, %v1283_v49 }
 0x116   : > { %2006 = vset.pattern.permute.xlu2 %v2116_v60  ;;  %974 = vperm.xlu1 %2005, %v2243_v13   ;;  %v2594_v4 = vpop.permute.xlu1 %541  ;;  %v1838_v13 = vsel %vm584_vm13, 1.0, %v2114_v37  ;;  %vm599_vm13 = vcmp.eq.s32.totalorder %v2324_v35, %v2532_v17 }
 0x117   : > { %977 = vperm.xlu2 %2006, %v2261_v18   ;;  %v2598_v22 = vpop.permute.xlu2 %571  ;;  %1019 = vperm.xlu0 %2007, %v3014_v62   ;;  %v2601_v12 = vpop.permute.xlu0 %547  ;;  %v679_v18 = vpack.c.bf16 %v1837_v53, %v1837_v53  ;;  %v680_v29 = vpack.c.bf16 %v1838_v13, %v1838_v13  ;;  %vm598_vm14 = vcmp.eq.s32.totalorder %v2324_v35, %v2594_v4  ;;  %v1853_v17 = vsel %vm599_vm13, 1.0, %v2114_v37  ;;  %v2017_v4 = vld [vmem:[%s2192_s27 + $0x48] sm:$0xff] }
 0x118   : > { %1578 = vmatpush.bf16.msra.mxu2 %v1320_v45  ;;  %vm608_vm4 = vcmp.eq.s32.totalorder %v2324_v35, %v2598_v22  ;;  %vm600_vm12 = vcmp.eq.s32.totalorder %v2324_v35, %v2601_v12 }
 0x119   : > { %v1287_v51 = vunpack.c.l.b16 %v679_v18  ;;  %v1288_v34 = vunpack.c.l.b16 %v680_v29  ;;  %v1854_v63 = vsel %vm600_vm12, 1.0, %v2114_v37 }
 0x11a   : > { %v696_v49 = vpack.c.bf16 %v1854_v63, %v1854_v63 }
 0x11b   : > { %v1317_v48 = vpack.c.b16 %v1288_v34, %v1287_v51 }
 0x11c   : > { %1579 = vmatpush.bf16.msra.mxu2 %v1319_v36 }
 0x11e   : > { %1025 = vperm.xlu1 %2005, %v2315_v31   ;;  %v2619_v47 = vpop.permute.xlu1 %550 }
 0x11f   : > { %968 = vperm.xlu2 %2006, %v2249_v15   ;;  %962 = vperm.xlu0 %2007, %v2234_v11   ;;  %v2624_v52 = vpop.permute.xlu0 %556  ;;  %v1316_v15 = vpack.c.b16 %v1286_v50, %v1285_v0  ;;  %vm601_vm10 = vcmp.eq.s32.totalorder %v2324_v35, %v2619_v47  ;;  %v1309_v47 = vunpack.c.l.b16 %v701_v39  ;;  %v2016_v50 = vld [vmem:[%s2192_s27 + $0x28] sm:$0xff] }
 0x120   : > { %v2626_v40 = vpop.permute.xlu2 %708  ;;  %1580 = vmatpush.bf16.msra.mxu2 %v1318_v21  ;;  %vm603_vm9 = vcmp.eq.s32.totalorder %v2324_v35, %v2624_v52  ;;  %v1855_v21 = vsel %vm601_vm10, 1.0, %v2114_v37 }
 0x121   : > { %v1857_v2 = vsel %vm603_vm9, 1.0, %v2114_v37  ;;  %v697_v46 = vpack.c.bf16 %v1855_v21, %v1855_v21  ;;  %v2024_v21 = vld [vmem:[%s2192_s27 + $0x80] sm:$0xff] }
 0x122   : > { %v699_v33 = vpack.c.bf16 %v1857_v2, %v1857_v2  ;;  %v2023_v2 = vld [vmem:[%s2192_s27 + $0x20] sm:$0xff] }
 0x123   : > { %v1305_v5 = vunpack.c.l.b16 %v697_v46 }
 0x124   : > { %1581 = vmatpush.bf16.msra.mxu2 %v1317_v48  ;;  %v1307_v12 = vunpack.c.l.b16 %v699_v33 }
 0x126   : > { %971 = vperm.xlu1 %2005, %v2246_v14   ;;  %v560_v43 = vpop.permute.xlu1 %559 }
 0x127   : > { %1016 = vperm.xlu2 %2006, %v3015_v9   ;;  %1013 = vperm.xlu0 %2007, %v2309_v30   ;;  %v566_v11 = vpop.permute.xlu0 %565  ;;  %vm604_vm8 = vcmp.eq.s32.totalorder %v2324_v35, %v560_v43 }
 0x128   : > { %v2631_v61 = vpop.permute.xlu2 %717  ;;  %1582 = vmatpush.bf16.msra.mxu2 %v1316_v15  ;;  %vm606_vm5 = vcmp.eq.s32.totalorder %v2324_v35, %v566_v11  ;;  %v1852_v15 = vsel %vm598_vm14, 1.0, %v2114_v37  ;;  %vm803_vm14 = vcmp.eq.s32.totalorder %v2324_v35, %v2626_v40 }
 0x129   : > { %vm806_vm12 = vcmp.eq.s32.totalorder %v2324_v35, %v2631_v61 }
 0x12c   : > { %1583 = vmatpush.bf16.msra.mxu2 %v1315_v3  ;;  %v694_v3 = vpack.c.bf16 %v1852_v15, %v1852_v15 }
 0x12e   : > { %2008 = vset.pattern.permute.xlu1 %v2115_v28  ;;  %v569_v24 = vpop.permute.xlu1 %568 }
 0x12f   : > { %2009 = vset.pattern.permute.xlu2 %v2115_v28  ;;  %956 = vperm.xlu0 %2007, %v2219_v7   ;;  %v575_v14 = vpop.permute.xlu0 %574  ;;  %vm607_vm3 = vcmp.eq.s32.totalorder %v2324_v35, %v569_v24  ;;  %v1304_v24 = vunpack.c.l.b16 %v696_v49 }
 0x130   : > { %798 = vperm.xlu1 %2008, %v2318_v32   ;;  %801 = vperm.xlu2 %2009, %v2315_v31   ;;  %v2638_v1 = vpop.permute.xlu2 %723  ;;  %vm609_vm2 = vcmp.eq.s32.totalorder %v2324_v35, %v575_v14  ;;  %v1861_v42 = vsel %vm607_vm3, 1.0, %v2114_v37  ;;  %v1862_v31 = vsel %vm608_vm4, 1.0, %v2114_v37 }
 0x131   : > { %v1863_v30 = vsel %vm609_vm2, 1.0, %v2114_v37  ;;  %v703_v53 = vpack.c.bf16 %v1861_v42, %v1861_v42  ;;  %v704_v8 = vpack.c.bf16 %v1862_v31, %v1862_v31  ;;  %v1302_v31 = vunpack.c.l.b16 %v694_v3 }
 0x132   : > { %v705_v7 = vpack.c.bf16 %v1863_v30, %v1863_v30  ;;  %v2018_v30 = vld [vmem:[%s2192_s27 + $0x10] sm:$0xff]  ;;  %vm808_vm13 = vcmp.eq.s32.totalorder %v2324_v35, %v2638_v1 }
 0x133   : > { %v1311_v36 = vunpack.c.l.b16 %v703_v53  ;;  %v1312_v57 = vunpack.c.l.b16 %v704_v8  ;;  %v2019_v53 = vld [vmem:[%s2192_s27 + $0x30] sm:$0xff] }
 0x134   : > { %v1313_v13 = vunpack.c.l.b16 %v705_v7 }
 0x135   : > { %v1329_v51 = vpack.c.b16 %v1312_v57, %v1311_v36 }
 0x136   : > { %v578_v19 = vpop.permute.xlu1 %577 }
 0x137   : > { %vm610_vm6 = vcmp.eq.s32.totalorder %v2324_v35, %v578_v19  ;;  %1007 = vperm.xlu0 %2007, %v2294_v26   ;;  %v1860_v26 = vsel %vm606_vm5, 1.0, %v2114_v37  ;;  %v693_v19 = vpack.c.bf16 %v1851_v54, %v1851_v54 }
 0x138   : > { %v1864_v32 = vsel %vm610_vm6, 1.0, %v2114_v37  ;;  %2010 = vset.pattern.permute.xlu1 %v2116_v60  ;;  %2011 = vset.pattern.permute.xlu2 %v2116_v60  ;;  %v2653_v20 = vpop.permute.xlu2 %732  ;;  %v2655_v45 = vpop.permute.xlu0 %711  ;;  %v702_v58 = vpack.c.bf16 %v1860_v26, %v1860_v26 }
 0x139   : > { %v706_v22 = vpack.c.bf16 %v1864_v32, %v1864_v32  ;;  %965 = vperm.xlu1 %2010, %v2231_v10   ;;  %1010 = vperm.xlu2 %2011, %v2291_v25   ;;  %v1858_v10 = vsel %vm604_vm8, 1.0, %v2114_v37  ;;  %v1301_v26 = vunpack.c.l.b16 %v693_v19  ;;  %vm811_vm6 = vcmp.eq.s32.totalorder %v2324_v35, %v2653_v20 }
 0x13a   : > { %v1310_v6 = vunpack.c.l.b16 %v702_v58  ;;  %v1873_v63 = vsel %vm811_vm6, 1.0, %v2114_v37 }
 0x13b   : > { %v1314_v18 = vunpack.c.l.b16 %v706_v22  ;;  %v2020_v22 = vld [vmem:[%s2192_s27 + $0x38] sm:$0xff] }
 0x13c   : > { %v1328_v52 = vpack.c.b16 %v1310_v6, %v1309_v47 }
 0x13d   : > { %v1330_v41 = vpack.c.b16 %v1314_v18, %v1313_v13  ;;  %v1324_v13 = vpack.c.b16 %v1302_v31, %v1301_v26  ;;  %v2021_v18 = vld [vmem:[%s2192_s27 + $0x98] sm:$0xff] }
 0x13f   : > { %998 = vperm.xlu0 %2007, %v2282_v23   ;;  %v2668_v25 = vpop.permute.xlu1 %714  ;;  %1589 = vmatpush.bf16.msra.mxu3 %v1330_v41  ;;  %v700_v23 = vpack.c.bf16 %v1858_v10, %v1858_v10  ;;  %v2022_v10 = vld [vmem:[%s2192_s27 + $0xb8] sm:$0xff] }
 0x140   : > { %v2672_v29 = vpop.permute.xlu2 %741  ;;  %v2674_v38 = vpop.permute.xlu0 %726  ;;  %vm805_vm15 = vcmp.eq.s32.totalorder %v2324_v35, %v2668_v25 }
 0x141   : > { %2012 = vset.pattern.permute.xlu1 %v2115_v28  ;;  %2013 = vset.pattern.permute.xlu2 %v2115_v28  ;;  %v1856_v28 = vsel %vm602_vm11, 1.0, %v2114_v37  ;;  %v1308_v34 = vunpack.c.l.b16 %v700_v23  ;;  %vm814_vm4 = vcmp.eq.s32.totalorder %v2324_v35, %v2672_v29  ;;  %vm809_vm8 = vcmp.eq.s32.totalorder %v2324_v35, %v2674_v38  ;;  %v2026_v38 = vld [vmem:[%s2192_s27 + $0xa8] sm:$0xff] }
 0x142   : > { %792 = vperm.xlu1 %2012, %v3015_v9   ;;  %795 = vperm.xlu2 %2013, %v3014_v62   ;;  %v698_v0 = vpack.c.bf16 %v1856_v28, %v1856_v28  ;;  %v695_v9 = vpack.c.bf16 %v1853_v17, %v1853_v17  ;;  %v1876_v16 = vsel %vm814_vm4, 1.0, %v2114_v37  ;;  %v1867_v61 = vsel %vm805_vm15, 1.0, %v2114_v37 }
 0x143   : > { %1590 = vmatpush.bf16.msra.mxu3 %v1329_v51  ;;  %v1327_v43 = vpack.c.b16 %v1308_v34, %v1307_v12  ;;  %v1871_v12 = vsel %vm809_vm8, 1.0, %v2114_v37  ;;  %vm804_vm4 = vcmp.eq.s32.totalorder %v2324_v35, %v2655_v45 }
 0x144   : > { %v1306_v11 = vunpack.c.l.b16 %v698_v0  ;;  %v1303_v42 = vunpack.c.l.b16 %v695_v9  ;;  %v2025_v0 = vld [vmem:[%s2192_s27 + $0xa0] sm:$0xff]  ;;  %v907_v9 = vpack.c.bf16 %v1873_v63, %v1873_v63  ;;  %v905_v54 = vpack.c.bf16 %v1871_v12, %v1871_v12  ;;  %v2030_v63 = vld [vmem:[%s2192_s27 + $0x8] sm:$0xff] }
 0x146   : > { %v1326_v14 = vpack.c.b16 %v1306_v11, %v1305_v5  ;;  %v1325_v32 = vpack.c.b16 %v1304_v24, %v1303_v42 }
 0x147   : > { %947 = vperm.xlu0 %2007, %v2016_v50   ;;  %v2691_v62 = vpop.permute.xlu1 %720  ;;  %1591 = vmatpush.bf16.msra.mxu3 %v1328_v52  ;;  %v910_v50 = vpack.c.bf16 %v1876_v16, %v1876_v16  ;;  %v901_v16 = vpack.c.bf16 %v1867_v61, %v1867_v61 }
 0x148   : > { %v751_v55 = vpop.permute.xlu2 %750  ;;  %v2695_v48 = vpop.permute.xlu0 %735 }
 0x149   : > { %vm817_vm0 = vcmp.eq.s32.totalorder %v2324_v35, %v751_v55  ;;  %vm812_vm5 = vcmp.eq.s32.totalorder %v2324_v35, %v2695_v48  ;;  %v1390_v11 = vunpack.c.l.b16 %v910_v50 }
 0x14a   : > { %2014 = vset.pattern.permute.xlu1 %v2116_v60  ;;  %2015 = vset.pattern.permute.xlu2 %v2116_v60  ;;  %v1879_v8 = vsel %vm817_vm0, 1.0, %v2114_v37  ;;  %v1874_v52 = vsel %vm812_vm5, 1.0, %v2114_v37  ;;  %vm807_vm0 = vcmp.eq.s32.totalorder %v2324_v35, %v2691_v62 }
 0x14b   : > { %959 = vperm.xlu1 %2014, %v2017_v4   ;;  %1004 = vperm.xlu2 %2015, %v2297_v27   ;;  %v913_v41 = vpack.c.bf16 %v1879_v8, %v1879_v8  ;;  %v908_v55 = vpack.c.bf16 %v1874_v52, %v1874_v52  ;;  %v1869_v26 = vsel %vm807_vm0, 1.0, %v2114_v37 }
 0x14c   : > { %1592 = vmatpush.bf16.msra.mxu3 %v1327_v43 }
 0x14d   : > { %v1393_v6 = vunpack.c.l.b16 %v913_v41  ;;  %v1388_v24 = vunpack.c.l.b16 %v908_v55 }
 0x14f   : > { %938 = vperm.xlu0 %2007, %v2018_v30   ;;  %v2707_v60 = vpop.permute.xlu1 %729 }
 0x150   : > { %v2709_v7 = vpop.permute.xlu2 %759  ;;  %1593 = vmatpush.bf16.msra.mxu3 %v1326_v14  ;;  %v745_v27 = vpop.permute.xlu0 %744  ;;  %vm810_vm10 = vcmp.eq.s32.totalorder %v2324_v35, %v2707_v60 }
 0x151   : > { %vm815_vm2 = vcmp.eq.s32.totalorder %v2324_v35, %v745_v27  ;;  %vm820_vm9 = vcmp.eq.s32.totalorder %v2324_v35, %v2709_v7  ;;  %v1872_v5 = vsel %vm810_vm10, 1.0, %v2114_v37 }
 0x152   : > { %v1877_v51 = vsel %vm815_vm2, 1.0, %v2114_v37  ;;  %v1882_v49 = vsel %vm820_vm9, 1.0, %v2114_v37  ;;  %v906_v60 = vpack.c.bf16 %v1872_v5, %v1872_v5 }
 0x153   : > { %950 = vperm.xlu1 %2014, %v2019_v53   ;;  %953 = vperm.xlu2 %2015, %v2020_v22   ;;  %v911_v56 = vpack.c.bf16 %v1877_v51, %v1877_v51  ;;  %v916_v14 = vpack.c.bf16 %v1882_v49, %v1882_v49  ;;  %v1868_v53 = vsel %vm806_vm12, 1.0, %v2114_v37  ;;  %v1870_v22 = vsel %vm808_vm13, 1.0, %v2114_v37 }
 0x154   : > { %1594 = vmatpush.bf16.msra.mxu3 %v1325_v32 }
 0x155   : > { %v1391_v48 = vunpack.c.l.b16 %v911_v56 }
 0x157   : > { %989 = vperm.xlu0 %2007, %v2021_v18   ;;  %v739_v59 = vpop.permute.xlu1 %738  ;;  %v2028_v18 = vld [vmem:[%s2192_s27 + $0x90] sm:$0xff] }
 0x158   : > { %v769_v58 = vpop.permute.xlu2 %768  ;;  %1595 = vmatpush.bf16.msra.mxu3 %v1324_v13  ;;  %v754_v36 = vpop.permute.xlu0 %753  ;;  %vm813_vm3 = vcmp.eq.s32.totalorder %v2324_v35, %v739_v59  ;;  %v2027_v13 = vld [vmem:[%s2192_s27 + $0x18] sm:$0xff]  ;;  %v1387_v59 = vunpack.c.l.b16 %v907_v9 }
 0x159   : > { %vm818_vm1 = vcmp.eq.s32.totalorder %v2324_v35, %v754_v36  ;;  %v1875_v47 = vsel %vm813_vm3, 1.0, %v2114_v37  ;;  %vm823_vm11 = vcmp.eq.s32.totalorder %v2324_v35, %v769_v58  ;;  %v2795_v58 = vunpack.c.l.b16 %v916_v14  ;;  %v2031_v14 = vld [vmem:[%s2192_s27 + $0x88] sm:$0xff] }
 0x15a   : > { %v1880_v39 = vsel %vm818_vm1, 1.0, %v2114_v37  ;;  %v909_v20 = vpack.c.bf16 %v1875_v47, %v1875_v47  ;;  %v1885_v15 = vsel %vm823_vm11, 1.0, %v2114_v37  ;;  %v1385_v36 = vunpack.c.l.b16 %v905_v54 }
 0x15b   : > { %v914_v57 = vpack.c.bf16 %v1880_v39, %v1880_v39  ;;  %1001 = vperm.xlu1 %2014, %v2022_v10   ;;  %944 = vperm.xlu2 %2015, %v2023_v2   ;;  %v919_v42 = vpack.c.bf16 %v1885_v15, %v1885_v15  ;;  %v1386_v10 = vunpack.c.l.b16 %v906_v60  ;;  %v1415_v2 = vpack.c.b16 %v1388_v24, %v1387_v59 }
 0x15c   : > { %1596 = vmatpush.bf16.msra.mxu3 %v1323_v44  ;;  %v1389_v43 = vunpack.c.l.b16 %v909_v20  ;;  %v1866_v20 = vsel %vm804_vm4, 1.0, %v2114_v37 }
 0x15d   : > { %v1394_v23 = vunpack.c.l.b16 %v914_v57  ;;  %v2799_v41 = vunpack.c.l.b16 %v919_v42  ;;  %v903_v57 = vpack.c.bf16 %v1869_v26, %v1869_v26 }
 0x15e   : > { %v1416_v32 = vpack.c.b16 %v1390_v11, %v1389_v43 }
 0x15f   : > { %980 = vperm.xlu0 %2007, %v2024_v21   ;;  %v748_v33 = vpop.permute.xlu1 %747  ;;  %v1418_v28 = vpack.c.b16 %v1394_v23, %v1393_v6  ;;  %v904_v23 = vpack.c.bf16 %v1870_v22, %v1870_v22  ;;  %v1383_v52 = vunpack.c.l.b16 %v903_v57 }
 0x160   : > { %vm816_vm7 = vcmp.eq.s32.totalorder %v2324_v35, %v748_v33  ;;  %v2736_v44 = vpop.permute.xlu2 %777  ;;  %v2738_v29 = vpop.permute.xlu0 %762  ;;  %v1865_v33 = vsel %vm803_vm14, 1.0, %v2114_v37 }
 0x161   : > { %v1878_v46 = vsel %vm816_vm7, 1.0, %v2114_v37  ;;  %1602 = vmatpush.bf16.msrb.mxu0 %v1418_v28  ;;  %vm821_vm3 = vcmp.eq.s32.totalorder %v2324_v35, %v2738_v29  ;;  %v902_v28 = vpack.c.bf16 %v1868_v53, %v1868_v53  ;;  %vm826_vm6 = vcmp.eq.s32.totalorder %v2324_v35, %v2736_v44 }
 0x162   : > { %v912_v34 = vpack.c.bf16 %v1878_v46, %v1878_v46  ;;  %v1883_v62 = vsel %vm821_vm3, 1.0, %v2114_v37  ;;  %v1414_v46 = vpack.c.b16 %v1386_v10, %v1385_v36  ;;  %v1384_v50 = vunpack.c.l.b16 %v904_v23 }
 0x163   : > { %992 = vperm.xlu1 %2014, %v2025_v0   ;;  %995 = vperm.xlu2 %2015, %v2026_v38   ;;  %v917_v47 = vpack.c.bf16 %v1883_v62, %v1883_v62  ;;  %v899_v38 = vpack.c.bf16 %v1865_v33, %v1865_v33  ;;  %v1382_v12 = vunpack.c.l.b16 %v902_v28  ;;  %v1888_v55 = vsel %vm826_vm6, 1.0, %v2114_v37 }
 0x164   : > { %v1392_v17 = vunpack.c.l.b16 %v912_v34  ;;  %v2029_v34 = vld [vmem:[%s2192_s27] sm:$0xff]  ;;  %v900_v44 = vpack.c.bf16 %v1866_v20, %v1866_v20  ;;  %v922_v43 = vpack.c.bf16 %v1888_v55, %v1888_v55 }
 0x165   : > { %v2826_v40 = vunpack.c.l.b16 %v917_v47  ;;  %v1379_v11 = vunpack.c.l.b16 %v899_v38 }
 0x166   : > { %v1417_v4 = vpack.c.b16 %v1392_v17, %v1391_v48  ;;  %v1381_v48 = vunpack.c.l.b16 %v901_v16  ;;  %v1413_v17 = vpack.c.b16 %v1384_v50, %v1383_v52  ;;  %v1380_v54 = vunpack.c.l.b16 %v900_v44 }
 0x167   : > { %v757_v3 = vpop.permute.xlu1 %756 }
 0x168   : > { %vm819_vm1 = vcmp.eq.s32.totalorder %v2324_v35, %v757_v3  ;;  %v772_v30 = vpop.permute.xlu0 %771  ;;  %1603 = vmatpush.bf16.msrb.mxu0 %v1417_v4  ;;  %v2771_v7 = vpop.permute.xlu2 %786  ;;  %v1412_v24 = vpack.c.b16 %v1382_v12, %v1381_v48  ;;  %v1411_v42 = vpack.c.b16 %v1380_v54, %v1379_v11 }
 0x169   : > { %v1881_v19 = vsel %vm819_vm1, 1.0, %v2114_v37  ;;  %vm824_vm2 = vcmp.eq.s32.totalorder %v2324_v35, %v772_v30  ;;  %v2838_v30 = vunpack.c.l.b16 %v922_v43 }
 0x16a   : > { %v915_v27 = vpack.c.bf16 %v1881_v19, %v1881_v19  ;;  %v1886_v31 = vsel %vm824_vm2, 1.0, %v2114_v37 }
 0x16b   : > { %v920_v8 = vpack.c.bf16 %v1886_v31, %v1886_v31  ;;  %941 = vperm.xlu1 %2014, %v2027_v13   ;;  %986 = vperm.xlu2 %2015, %v2028_v18  }
 0x16c   : > { %v2797_v1 = vunpack.c.l.b16 %v915_v27  ;;  %1604 = vmatpush.bf16.msrb.mxu0 %v1416_v32 }
 0x16d   : > { %v2805_v39 = vunpack.c.l.b16 %v920_v8 }
 0x16e   : > { %v1419_v25 = vpack.c.b16 %v2795_v58, %v2797_v1 }
 0x16f   : > { %v766_v6 = vpop.permute.xlu1 %765  ;;  %v1421_v51 = vpack.c.b16 %v2805_v39, %v2799_v41 }
 0x170   : > { %vm822_vm5 = vcmp.eq.s32.totalorder %v2324_v35, %v766_v6  ;;  %v2814_v21 = vpop.permute.xlu0 %780  ;;  %1605 = vmatpush.bf16.msrb.mxu0 %v1415_v2 }
 0x171   : > { %v1884_v56 = vsel %vm822_vm5, 1.0, %v2114_v37  ;;  %v978_v29 = vpop.permute.xlu2 %977 }
 0x172   : > { %v918_v45 = vpack.c.bf16 %v1884_v56, %v1884_v56  ;;  %vm1042_vm8 = vcmp.eq.s32.totalorder %v2324_v35, %v978_v29 }
 0x173   : > { %932 = vperm.xlu1 %2014, %v2029_v34   ;;  %935 = vperm.xlu2 %2015, %v2030_v63   ;;  %v1912_v53 = vsel %vm1042_vm8, 1.0, %v2114_v37 }
 0x174   : > { %v2828_v0 = vunpack.c.l.b16 %v918_v45  ;;  %1606 = vmatpush.bf16.msrb.mxu0 %v1414_v46  ;;  %v1138_v22 = vpack.c.bf16 %v1912_v53, %v1912_v53 }
 0x176   : > { %v1420_v49 = vpack.c.b16 %v2828_v0, %v2826_v40  ;;  %v1490_v59 = vunpack.c.l.b16 %v1138_v22 }
 0x177   : > { %v775_v5 = vpop.permute.xlu1 %774 }
 0x178   : > { %vm825_vm7 = vcmp.eq.s32.totalorder %v2324_v35, %v775_v5  ;;  %v2834_v15 = vpop.permute.xlu0 %789  ;;  %1607 = vmatpush.bf16.msrb.mxu0 %v1413_v17 }
 0x179   : > { %v1887_v4 = vsel %vm825_vm7, 1.0, %v2114_v37  ;;  %v969_v9 = vpop.permute.xlu2 %968 }
 0x17a   : > { %v921_v3 = vpack.c.bf16 %v1887_v4, %v1887_v4  ;;  %vm1039_vm14 = vcmp.eq.s32.totalorder %v2324_v35, %v969_v9 }
 0x17b   : > { %983 = vperm.xlu1 %2014, %v2031_v14   ;;  %v1909_v20 = vsel %vm1039_vm14, 1.0, %v2114_v37 }
 0x17c   : > { %v2840_v60 = vunpack.c.l.b16 %v921_v3  ;;  %1608 = vmatpush.bf16.msrb.mxu0 %v1412_v24  ;;  %v1135_v55 = vpack.c.bf16 %v1909_v20, %v1909_v20 }
 0x17e   : > { %v1422_v19 = vpack.c.b16 %v2838_v30, %v2840_v60  ;;  %v1487_v54 = vunpack.c.l.b16 %v1135_v55 }
 0x17f   : > { %v2844_v27 = vpop.permute.xlu1 %783 }
 0x180   : > { %1609 = vmatpush.bf16.msrb.mxu0 %v1411_v42 }
 0x181   : > { %v1023_v31 = vpop.permute.xlu0 %1022  ;;  %v1017_v32 = vpop.permute.xlu2 %1016 }
 0x182   : > { %vm1057_vm9 = vcmp.eq.s32.totalorder %v2324_v35, %v1023_v31  ;;  %vm1055_vm11 = vcmp.eq.s32.totalorder %v2324_v35, %v1017_v32 }
 0x183   : > { %v1927_v36 = vsel %vm1057_vm9, 1.0, %v2114_v37  ;;  %v1925_v2 = vsel %vm1055_vm11, 1.0, %v2114_v37  ;;  %vm830_vm9 = vcmp.eq.s32.totalorder %v2324_v35, %v2834_v15  ;;  %vm828_vm11 = vcmp.eq.s32.totalorder %v2324_v35, %v2844_v27 }
 0x184   : > { %v1153_v57 = vpack.c.bf16 %v1927_v36, %v1927_v36  ;;  %v1151_v16 = vpack.c.bf16 %v1925_v2, %v1925_v2 }
 0x186   : > { %v1505_v28 = vunpack.c.l.b16 %v1153_v57  ;;  %v1503_v34 = vunpack.c.l.b16 %v1151_v16 }
 0x188   : > { %v975_v26 = vpop.permute.xlu1 %974 }
 0x189   : > { %vm1041_vm10 = vcmp.eq.s32.totalorder %v2324_v35, %v975_v26  ;;  %v1020_v8 = vpop.permute.xlu0 %1019 }
 0x18a   : > { %v1911_v13 = vsel %vm1041_vm10, 1.0, %v2114_v37  ;;  %v802_v18 = vpop.permute.xlu2 %801  ;;  %vm1056_vm12 = vcmp.eq.s32.totalorder %v2324_v35, %v1020_v8  ;;  %vm829_vm10 = vcmp.eq.s32.totalorder %v2324_v35, %v2771_v7 }
 0x18b   : > { %v1137_v61 = vpack.c.bf16 %v1911_v13, %v1911_v13  ;;  %v1926_v6 = vsel %vm1056_vm12, 1.0, %v2114_v37  ;;  %vm834_vm2 = vcmp.eq.s32.totalorder %v2324_v35, %v802_v18  ;;  %v1891_v15 = vsel %vm829_vm10, 1.0, %v2114_v37 }
 0x18c   : > { %v1152_v56 = vpack.c.bf16 %v1926_v6, %v1926_v6  ;;  %v1896_v24 = vsel %vm834_vm2, 1.0, %v2114_v37 }
 0x18d   : > { %v1489_v62 = vunpack.c.l.b16 %v1137_v61  ;;  %v930_v32 = vpack.c.bf16 %v1896_v24, %v1896_v24 }
 0x18e   : > { %v1504_v63 = vunpack.c.l.b16 %v1152_v56 }
 0x18f   : > { %v1514_v10 = vpack.c.b16 %v1490_v59, %v1489_v62  ;;  %v1410_v8 = vunpack.c.l.b16 %v930_v32 }
 0x190   : > { %v1026_v23 = vpop.permute.xlu1 %1025  ;;  %v1521_v43 = vpack.c.b16 %v1504_v63, %v1503_v34  ;;  %v1892_v63 = vsel %vm830_vm9, 1.0, %v2114_v37 }
 0x191   : > { %vm1058_vm13 = vcmp.eq.s32.totalorder %v2324_v35, %v1026_v23  ;;  %v963_v47 = vpop.permute.xlu0 %962  ;;  %1628 = vmatpush.bf16.msrb.mxu2 %v1514_v10  ;;  %v926_v55 = vpack.c.bf16 %v1892_v63, %v1892_v63 }
 0x192   : > { %v1928_v33 = vsel %vm1058_vm13, 1.0, %v2114_v37  ;;  %vm1037_vm4 = vcmp.eq.s32.totalorder %v2324_v35, %v963_v47  ;;  %vm827_vm13 = vcmp.eq.s32.totalorder %v2324_v35, %v2814_v21  ;;  %v224_v21 = vld [vmem:[%s3001_s0] sm:$0xff] }
 0x193   : > { %v1154_v29 = vpack.c.bf16 %v1928_v33, %v1928_v33  ;;  %v1011_v52 = vpop.permute.xlu2 %1010  ;;  %v1907_v62 = vsel %vm1037_vm4, 1.0, %v2114_v37  ;;  %v1544_v32 = vunpack.c.l.b16 %v224_v21 }
 0x194   : > { %vm1053_vm15 = vcmp.eq.s32.totalorder %v2324_v35, %v1011_v52  ;;  %v1133_v23 = vpack.c.bf16 %v1907_v62, %v1907_v62 }
 0x195   : > { %v1506_v45 = vunpack.c.l.b16 %v1154_v29  ;;  %v1923_v46 = vsel %vm1053_vm15, 1.0, %v2114_v37 }
 0x196   : > { %v1149_v38 = vpack.c.bf16 %v1923_v46, %v1923_v46  ;;  %v1485_v29 = vunpack.c.l.b16 %v1133_v23 }
 0x197   : > { %v1522_v50 = vpack.c.b16 %v1506_v45, %v1505_v28 }
 0x198   : > { %v972_v12 = vpop.permute.xlu1 %971  ;;  %v1501_v4 = vunpack.c.l.b16 %v1149_v38 }
 0x199   : > { %vm1040_vm0 = vcmp.eq.s32.totalorder %v2324_v35, %v972_v12  ;;  %v1014_v44 = vpop.permute.xlu0 %1013  ;;  %1641 = vmatpush.bf16.msrb.mxu3 %v1522_v50 }
 0x19a   : > { %v1910_v48 = vsel %vm1040_vm0, 1.0, %v2114_v37  ;;  %vm1054_vm1 = vcmp.eq.s32.totalorder %v2324_v35, %v1014_v44 }
 0x19b   : > { %v1136_v17 = vpack.c.bf16 %v1910_v48, %v1910_v48  ;;  %v1924_v5 = vsel %vm1054_vm1, 1.0, %v2114_v37 }
 0x19c   : > { %v1150_v9 = vpack.c.bf16 %v1924_v5, %v1924_v5  ;;  %v796_v11 = vpop.permute.xlu2 %795  ;;  %v1890_v5 = vsel %vm828_vm11, 1.0, %v2114_v37 }
 0x19d   : > { %v1488_v3 = vunpack.c.l.b16 %v1136_v17  ;;  %1642 = vmatpush.bf16.msrb.mxu3 %v1521_v43  ;;  %vm832_vm8 = vcmp.eq.s32.totalorder %v2324_v35, %v796_v11  ;;  %v925_v17 = vpack.c.bf16 %v1891_v15, %v1891_v15  ;;  %v924_v27 = vpack.c.bf16 %v1890_v5, %v1890_v5 }
 0x19e   : > { %v1502_v14 = vunpack.c.l.b16 %v1150_v9  ;;  %v1894_v52 = vsel %vm832_vm8, 1.0, %v2114_v37  ;;  %v1406_v9 = vunpack.c.l.b16 %v926_v55 }
 0x19f   : > { %v1513_v42 = vpack.c.b16 %v1488_v3, %v1487_v54  ;;  %v928_v50 = vpack.c.bf16 %v1894_v52, %v1894_v52  ;;  %v1405_v24 = vunpack.c.l.b16 %v925_v17 }
 0x1a0   : > { %v1520_v31 = vpack.c.b16 %v1502_v14, %v1501_v4  ;;  %v1889_v4 = vsel %vm827_vm13, 1.0, %v2114_v37 }
 0x1a1   : > { %v957_v53 = vpop.permute.xlu0 %956  ;;  %1629 = vmatpush.bf16.msrb.mxu2 %v1513_v42  ;;  %v1408_v7 = vunpack.c.l.b16 %v928_v50  ;;  %v923_v14 = vpack.c.bf16 %v1889_v4, %v1889_v4 }
 0x1a2   : > { %v799_v22 = vpop.permute.xlu1 %798  ;;  %1643 = vmatpush.bf16.msrb.mxu3 %v1520_v31  ;;  %vm1035_vm14 = vcmp.eq.s32.totalorder %v2324_v35, %v957_v53  ;;  %v1545_v53 = vunpack.c.h.b16 %v224_v21 }
 0x1a3   : > { %vm833_vm3 = vcmp.eq.s32.totalorder %v2324_v35, %v799_v22  ;;  %v1905_v11 = vsel %vm1035_vm14, 1.0, %v2114_v37  ;;  %v1403_v62 = vunpack.c.l.b16 %v923_v14 }
 0x1a4   : > { %v1895_v26 = vsel %vm833_vm3, 1.0, %v2114_v37  ;;  %v1131_v22 = vpack.c.bf16 %v1905_v11, %v1905_v11 }
 0x1a5   : > { %v929_v13 = vpack.c.bf16 %v1895_v26, %v1895_v26  ;;  %v1005_v18 = vpop.permute.xlu2 %1004  ;;  %v1424_v26 = vpack.c.b16 %v1406_v9, %v1405_v24 }
 0x1a6   : > { %vm1051_vm5 = vcmp.eq.s32.totalorder %v2324_v35, %v1005_v18  ;;  %v2904_v18 = vpack.c.b16 %v1544_v32, %v1544_v32 }
 0x1a7   : > { %v1409_v59 = vunpack.c.l.b16 %v929_v13  ;;  %v1921_v61 = vsel %vm1051_vm5, 1.0, %v2114_v37 }
 0x1a8   : > { %v1147_v36 = vpack.c.bf16 %v1921_v61, %v1921_v61  ;;  %1584 = vmatmul.bf16.vlgmr.msra.gmra.mxu2 %v2904_v18  ;;  %1558 = vmatmul.bf16.vlgmr.msra.gmra.mxu0 %v2904_v18 }
 0x1a9   : > { %v1008_v57 = vpop.permute.xlu0 %1007  ;;  %v1426_v10 = vpack.c.b16 %v1410_v8, %v1409_v59  ;;  %v1404_v8 = vunpack.c.l.b16 %v924_v27  ;;  %v2906_v59 = vpack.c.b16 %v1545_v53, %v1545_v53 }
 0x1aa   : > { %vm1052_vm6 = vcmp.eq.s32.totalorder %v2324_v35, %v1008_v57  ;;  %v1499_v33 = vunpack.c.l.b16 %v1147_v36  ;;  %v1483_v57 = vunpack.c.l.b16 %v1131_v22 }
 0x1ab   : > { %v1922_v2 = vsel %vm1052_vm6, 1.0, %v2114_v37  ;;  %v966_v6 = vpop.permute.xlu1 %965  ;;  %1615 = vmatpush.bf16.msrb.mxu1 %v1426_v10  ;;  %1597 = vmatmul.bf16.vlgmr.msra.gmra.mxu3 %v2906_v59 }
 0x1ac   : > { %v1148_v28 = vpack.c.bf16 %v1922_v2, %v1922_v2  ;;  %vm1038_vm7 = vcmp.eq.s32.totalorder %v2324_v35, %v966_v6  ;;  %v1423_v6 = vpack.c.b16 %v1404_v8, %v1403_v62  ;;  %1571 = vmatmul.bf16.vlgmr.msra.gmra.mxu1 %v2906_v59 }
 0x1ad   : > { %v1908_v47 = vsel %vm1038_vm7, 1.0, %v2114_v37  ;;  %v954_v38 = vpop.permute.xlu2 %953 }
 0x1ae   : > { %v1500_v16 = vunpack.c.l.b16 %v1148_v28  ;;  %v1134_v56 = vpack.c.bf16 %v1908_v47, %v1908_v47  ;;  %vm1034_vm15 = vcmp.eq.s32.totalorder %v2324_v35, %v954_v38 }
 0x1af   : > { %v1904_v61 = vsel %vm1034_vm15, 1.0, %v2114_v37 }
 0x1b0   : > { %v1486_v45 = vunpack.c.l.b16 %v1134_v56  ;;  %v1519_v46 = vpack.c.b16 %v1500_v16, %v1499_v33  ;;  %v1130_v2 = vpack.c.bf16 %v1904_v61, %v1904_v61 }
 0x1b1   : > { %v2882_v20 = vpop.permute.xlu0 %998 }
 0x1b2   : > { %1644 = vmatpush.bf16.msrb.mxu3 %v1519_v46  ;;  %v1512_v34 = vpack.c.b16 %v1486_v45, %v1485_v29  ;;  %v1482_v56 = vunpack.c.l.b16 %v1130_v2  ;;  %vm1049_vm4 = vcmp.eq.s32.totalorder %v2324_v35, %v2882_v20 }
 0x1b3   : > { %v1919_v50 = vsel %vm1049_vm4, 1.0, %v2114_v37 }
 0x1b4   : > { %v793_v12 = vpop.permute.xlu1 %792  ;;  %1630 = vmatpush.bf16.msrb.mxu2 %v1512_v34 }
 0x1b5   : > { %vm831_vm12 = vcmp.eq.s32.totalorder %v2324_v35, %v793_v12  ;;  %v945_v42 = vpop.permute.xlu2 %944 }
 0x1b6   : > { %v1893_v44 = vsel %vm831_vm12, 1.0, %v2114_v37  ;;  %vm1031_vm1 = vcmp.eq.s32.totalorder %v2324_v35, %v945_v42 }
 0x1b7   : > { %v927_v48 = vpack.c.bf16 %v1893_v44, %v1893_v44  ;;  %v1901_v33 = vsel %vm1031_vm1, 1.0, %v2114_v37  ;;  %v1145_v44 = vpack.c.bf16 %v1919_v50, %v1919_v50 }
 0x1b8   : > { %v1127_v45 = vpack.c.bf16 %v1901_v33, %v1901_v33  ;;  %1610 = vmatmul.bf16.vlgmr.msrb.gmra.mxu0 %v2904_v18 }
 0x1b9   : > { %v1407_v43 = vunpack.c.l.b16 %v927_v48  ;;  %v948_v54 = vpop.permute.xlu0 %947  ;;  %v1497_v48 = vunpack.c.l.b16 %v1145_v44 }
 0x1ba   : > { %vm1032_vm2 = vcmp.eq.s32.totalorder %v2324_v35, %v948_v54  ;;  %v1479_v38 = vunpack.c.l.b16 %v1127_v45 }
 0x1bb   : > { %v1425_v3 = vpack.c.b16 %v1408_v7, %v1407_v43  ;;  %v1902_v28 = vsel %vm1032_vm2, 1.0, %v2114_v37 }
 0x1bc   : > { %v1128_v46 = vpack.c.bf16 %v1902_v28, %v1902_v28 }
 0x1bd   : > { %v960_v31 = vpop.permute.xlu1 %959  ;;  %1616 = vmatpush.bf16.msrb.mxu1 %v1425_v3  ;;  %v996_v29 = vpop.permute.xlu2 %995 }
 0x1be   : > { %vm1036_vm0 = vcmp.eq.s32.totalorder %v2324_v35, %v960_v31  ;;  %v1480_v12 = vunpack.c.l.b16 %v1128_v46  ;;  %vm1048_vm6 = vcmp.eq.s32.totalorder %v2324_v35, %v996_v29 }
 0x1bf   : > { %v1906_v13 = vsel %vm1036_vm0, 1.0, %v2114_v37  ;;  %v1918_v39 = vsel %vm1048_vm6, 1.0, %v2114_v37 }
 0x1c0   : > { %v1132_v36 = vpack.c.bf16 %v1906_v13, %v1906_v13  ;;  %v1509_v60 = vpack.c.b16 %v1480_v12, %v1479_v38  ;;  %v1144_v40 = vpack.c.bf16 %v1918_v39, %v1918_v39 }
 0x1c1   : > { %1617 = vmatpush.bf16.msrb.mxu1 %v1424_v26  ;;  %v939_v47 = vpop.permute.xlu0 %938 }
 0x1c2   : > { %v1484_v10 = vunpack.c.l.b16 %v1132_v36  ;;  %vm1029_vm10 = vcmp.eq.s32.totalorder %v2324_v35, %v939_v47  ;;  %v1496_v9 = vunpack.c.l.b16 %v1144_v40 }
 0x1c3   : > { %v1899_v58 = vsel %vm1029_vm10, 1.0, %v2114_v37 }
 0x1c4   : > { %v1511_v23 = vpack.c.b16 %v1484_v10, %v1483_v57  ;;  %v1125_v24 = vpack.c.bf16 %v1899_v58, %v1899_v58 }
 0x1c5   : > { %v951_v16 = vpop.permute.xlu1 %950  ;;  %1618 = vmatpush.bf16.msrb.mxu1 %v1423_v6 }
 0x1c6   : > { %vm1033_vm3 = vcmp.eq.s32.totalorder %v2324_v35, %v951_v16  ;;  %1631 = vmatpush.bf16.msrb.mxu2 %v1511_v23  ;;  %v1477_v32 = vunpack.c.l.b16 %v1125_v24 }
 0x1c7   : > { %v1903_v52 = vsel %vm1033_vm3, 1.0, %v2114_v37 }
 0x1c8   : > { %v1129_v34 = vpack.c.bf16 %v1903_v52, %v1903_v52 }
 0x1c9   : > { %1619 = vmatpush.bf16.msrb.mxu1 %v1422_v19  ;;  %v990_v20 = vpop.permute.xlu0 %989  ;;  %v987_v19 = vpop.permute.xlu2 %986 }
 0x1ca   : > { %v1481_v63 = vunpack.c.l.b16 %v1129_v34  ;;  %vm1046_vm7 = vcmp.eq.s32.totalorder %v2324_v35, %v990_v20  ;;  %vm1045_vm8 = vcmp.eq.s32.totalorder %v2324_v35, %v987_v19 }
 0x1cb   : > { %v1916_v17 = vsel %vm1046_vm7, 1.0, %v2114_v37  ;;  %v1915_v0 = vsel %vm1045_vm8, 1.0, %v2114_v37 }
 0x1cc   : > { %v1510_v15 = vpack.c.b16 %v1482_v56, %v1481_v63  ;;  %v1142_v43 = vpack.c.bf16 %v1916_v17, %v1916_v17  ;;  %v1141_v27 = vpack.c.bf16 %v1915_v0, %v1915_v0 }
 0x1cd   : > { %v1002_v55 = vpop.permute.xlu1 %1001  ;;  %1620 = vmatpush.bf16.msrb.mxu1 %v1421_v51 }
 0x1ce   : > { %vm1050_vm5 = vcmp.eq.s32.totalorder %v2324_v35, %v1002_v55  ;;  %1632 = vmatpush.bf16.msrb.mxu2 %v1510_v15  ;;  %v1494_v1 = vunpack.c.l.b16 %v1142_v43  ;;  %v1493_v21 = vunpack.c.l.b16 %v1141_v27 }
 0x1cf   : > { %v1920_v7 = vsel %vm1050_vm5, 1.0, %v2114_v37 }
 0x1d0   : > { %v1146_v30 = vpack.c.bf16 %v1920_v7, %v1920_v7  ;;  %v1516_v31 = vpack.c.b16 %v1494_v1, %v1493_v21 }
 0x1d1   : > { %1621 = vmatpush.bf16.msrb.mxu1 %v1420_v49  ;;  %v936_v54 = vpop.permute.xlu2 %935  ;;  %v981_v8 = vpop.permute.xlu0 %980 }
 0x1d2   : > { %v1498_v41 = vunpack.c.l.b16 %v1146_v30  ;;  %1633 = vmatpush.bf16.msrb.mxu2 %v1509_v60  ;;  %vm1028_vm12 = vcmp.eq.s32.totalorder %v2324_v35, %v936_v54  ;;  %vm1043_vm14 = vcmp.eq.s32.totalorder %v2324_v35, %v981_v8 }
 0x1d3   : > { %v1898_v22 = vsel %vm1028_vm12, 1.0, %v2114_v37  ;;  %v1913_v2 = vsel %vm1043_vm14, 1.0, %v2114_v37 }
 0x1d4   : > { %v1518_v51 = vpack.c.b16 %v1498_v41, %v1497_v48  ;;  %v1124_v61 = vpack.c.bf16 %v1898_v22, %v1898_v22  ;;  %v1139_v33 = vpack.c.bf16 %v1913_v2, %v1913_v2 }
 0x1d5   : > { %v993_v5 = vpop.permute.xlu1 %992  ;;  %1622 = vmatpush.bf16.msrb.mxu1 %v1419_v25 }
 0x1d6   : > { %vm1047_vm9 = vcmp.eq.s32.totalorder %v2324_v35, %v993_v5  ;;  %1645 = vmatpush.bf16.msrb.mxu3 %v1518_v51  ;;  %v1476_v57 = vunpack.c.l.b16 %v1124_v61  ;;  %v1491_v16 = vunpack.c.l.b16 %v1139_v33 }
 0x1d7   : > { %v1917_v49 = vsel %vm1047_vm9, 1.0, %v2114_v37 }
 0x1d8   : > { %v1143_v4 = vpack.c.bf16 %v1917_v49, %v1917_v49  ;;  %1623 = vmatmul.bf16.vlgmr.msrb.gmra.mxu1 %v2906_v59 }
 0x1da   : > { %v1495_v11 = vunpack.c.l.b16 %v1143_v4 }
 0x1dc   : > { %v1517_v25 = vpack.c.b16 %v1496_v9, %v1495_v11 }
 0x1dd   : > { %v942_v3 = vpop.permute.xlu1 %941 }
 0x1de   : > { %vm1030_vm11 = vcmp.eq.s32.totalorder %v2324_v35, %v942_v3  ;;  %1646 = vmatpush.bf16.msrb.mxu3 %v1517_v25 }
 0x1df   : > { %v1900_v14 = vsel %vm1030_vm11, 1.0, %v2114_v37 }
 0x1e0   : > { %v1126_v42 = vpack.c.bf16 %v1900_v14, %v1900_v14 }
 0x1e2   : > { %v1478_v53 = vunpack.c.l.b16 %v1126_v42  ;;  %1647 = vmatpush.bf16.msrb.mxu3 %v1516_v31 }
 0x1e4   : > { %v1508_v26 = vpack.c.b16 %v1478_v53, %v1477_v32 }
 0x1e5   : > { %v933_v13 = vpop.permute.xlu1 %932 }
 0x1e6   : > { %vm1027_vm13 = vcmp.eq.s32.totalorder %v2324_v35, %v933_v13  ;;  %1634 = vmatpush.bf16.msrb.mxu2 %v1508_v26 }
 0x1e7   : > { %v1897_v36 = vsel %vm1027_vm13, 1.0, %v2114_v37 }
 0x1e8   : > { %v1123_v62 = vpack.c.bf16 %v1897_v36, %v1897_v36 }
 0x1ea   : > { %v1475_v10 = vunpack.c.l.b16 %v1123_v62 }
 0x1ec   : > { %v1507_v6 = vpack.c.b16 %v1476_v57, %v1475_v10 }
 0x1ed   : > { %v984_v23 = vpop.permute.xlu1 %983 }
 0x1ee   : > { %vm1044_vm15 = vcmp.eq.s32.totalorder %v2324_v35, %v984_v23  ;;  %1635 = vmatpush.bf16.msrb.mxu2 %v1507_v6 }
 0x1ef   : > { %v1914_v28 = vsel %vm1044_vm15, 1.0, %v2114_v37 }
 0x1f0   : > { %v1140_v47 = vpack.c.bf16 %v1914_v28, %v1914_v28 }
 0x1f1   : > { %1636 = vmatmul.bf16.vlgmr.msrb.gmra.mxu2 %v2904_v18 }
 0x1f2   : > { %v1492_v56 = vunpack.c.l.b16 %v1140_v47 }
 0x1f4   : > { %v1515_v29 = vpack.c.b16 %v1492_v56, %v1491_v16 }
 0x1f6   : > { %1648 = vmatpush.bf16.msrb.mxu3 %v1515_v29 }
 0x1f9   : > { %1649 = vmatmul.bf16.vlgmr.msrb.gmra.mxu3 %v2906_v59 }
 0x225   : > { %v1559_v52 = vpop.f32.mrf.mxu0 }
 0x229   : > { %v1572_v45 = vpop.f32.mrf.mxu1 }
 0x22a   : > { %v1573_v46 = vadd.f32 %v1572_v45, %v1559_v52 }
 0x22b   : > { %v1585_v35 = vpop.f32.mrf.mxu2 }
 0x22c   : > { %1669 = vst [vmem:[%s194_s4] sm:$0xff] %v1573_v46 }
 0x22d   : > { %v1561_v63 = vpop.f32.mrf.mxu0 }
 0x22e   : > { %v1598_v37 = vpop.f32.mrf.mxu3 }
 0x22f   : > { %v1599_v34 = vadd.f32 %v1598_v37, %v1585_v35 }
 0x231   : > { %1670 = vst [vmem:[%s194_s4 + $0x8] sm:$0xff] %v1599_v34  ;;  %v1574_v18 = vpop.f32.mrf.mxu1 }
 0x233   : > { %v1587_v50 = vpop.f32.mrf.mxu2 }
 0x235   : > { %v1611_v12 = vpop.f32.mrf.mxu0 }
 0x236   : > { %v1600_v38 = vpop.f32.mrf.mxu3 }
 0x23d   : > { %v1613_v55 = vpop.f32.mrf.mxu0 }
 0x255   : > { %v1624_v15 = vpop.f32.mrf.mxu1 }
 0x256   : > { %v1625_v59 = vadd.f32 %v1624_v15, %v1611_v12 }
 0x258   : > { %1671 = vst [vmem:[%s194_s4 + $0x10] sm:$0xff] %v1625_v59 }
 0x25d   : > { %v1626_v44 = vpop.f32.mrf.mxu1 }
 0x274   : > { %v1637_v20 = vpop.f32.mrf.mxu2 }
 0x27c   : > { %v1639_v7 = vpop.f32.mrf.mxu2  ;;  %v1650_v30 = vpop.f32.mrf.mxu3 }
 0x27d   : > { %v1651_v60 = vadd.f32 %v1650_v30, %v1637_v20 }
 0x27f   : > { %1672 = vst [vmem:[%s194_s4 + $0x18] sm:$0xff] %v1651_v60 }
 0x280   : > { %2059 = shalt.err (!%p2056_p5)
}
 0x281   : > { %1936 = dma.vmem_to_hbm [thread:$0]  (%p2172_p4), %s1690_s15, 512, %s1692_s16, %s1674_s18  }
 0x284   : > { %v1652_v19 = vpop.f32.mrf.mxu3 }
 0x285 PF: > { %p1942_p6 = scmp.ge.s32.totalorder %s2110_s14, 2  ;;  %s1703_s28 = sand.u32 1, %s2090_s9  }
 0x286   : > { %s1704_s29 = scalar_lea.sflag [#allocation4], %s1703_s28 }
 0x287   : > { %p1939_p7 = pnand %p1942_p6, %p2179_p8 }
 0x289   : > { %p1940_p9 = pneg %p1939_p7 }
 0x28b   : > { %2085 = dma.done.wait (%p1940_p9), %s1704_s29, 512  }
 0x28c   : > { %2087 = vsyncadd (%p1940_p9), %s1704_s29, 4294966784  ;;  %s15_s14 = sadd.s32 1, %s2110_s14   ;;  %s3016_s9 = smov %s2094_s10 }
 0x28d   : > { %p12_p10 = scmp.ge.s32.totalorder %s15_s14, 6   ;;  %s3017_s10 = smov %s2098_s11 }
 0x28e   : > { %s3018_s11 = smov %s2185_s22  ;;  %s3019_s12 = smov %s2106_s13 }
 0x28f   : > { %s3020_s13 = smov %s3022_s17  ;;  %14 = sbr.rel (!%p12_p10) target bundleno = 4 (0x4), region = 74 }
 0x294   :  { %1710 = vsyncpa [#allocation4], 1 }
 0x295   :  { %1712 = vsyncpa [#allocation4 + $0x1], 1 }

</bundles_post_ra>
